<compile_context>
chip_gen: v5e
topology: v5e:2x2
jax: 0.10.0
libtpu: 0.0.40
codegen_flags: <defaults>
</compile_context>

<pallas_src>
import functools

import jax
import jax.numpy as jnp
from jax import lax
from jax.experimental import pallas as pl
from jax.experimental.pallas import tpu as pltpu


# ----------------------- vector-slab row layout (per layer) -----------------------
_ROW_SA_BQKV = 0   # width 3*D
_ROW_SA_BO   = 1   # D
_ROW_NORM_G  = 2   # D
_ROW_NORM_B  = 3   # D
_ROW_CA_BQ   = 4   # D
_ROW_CA_BKV  = 5   # 2*D
_ROW_CA_BO   = 6   # D
_ROW_L1G     = 7   # D
_ROW_L1B     = 8   # D
_ROW_FB1     = 9   # forward_expansion*D
_ROW_FB2     = 10  # D
_ROW_L2G     = 11  # D
_ROW_L2B     = 12  # D
_N_VEC_ROWS  = 13


# ----------------------------- fused Pallas kernel -----------------------------

def _decoder_kernel(x_ref, enc_ref, tb_ref, sb_ref,
                    sa_wqkv_ref, sa_wo_ref,
                    ca_wq_ref, ca_wkv_ref, ca_wo_ref,
                    fw1_ref, fw2_ref,
                    vec_ref, fcw_ref, fcb_ref,
                    o_ref,
                    *, n_layers, n_head, d_k, eps):
    """Entire decoder stack for one batch element (one grid step)."""
    x = x_ref[0]            # (Sq, D)  embedded target tokens
    enc = enc_ref[0]        # (Sk, D)  encoder features
    tb = tb_ref[0]          # (Sq, Sq) additive target (causal) bias
    sb = sb_ref[0]          # (Sq, Sk) additive source (padding) bias

    H, dk = n_head, d_k
    Sq, D = x.shape
    Sk = enc.shape[0]
    d_ff = fw1_ref.shape[-1]
    inv_scale = 1.0 / (float(dk) ** 0.5)

    def mm(a, w):
        # cast the activation operand to the weight dtype (bf16 when the
        # use_bf16_matmul flag is on; no-op for f32 weights), accumulate in f32.
        return jnp.dot(a.astype(w.dtype), w, preferred_element_type=jnp.float32)

    def layer_norm(v, g, b):
        mu = jnp.mean(v, axis=-1, keepdims=True)
        var = jnp.mean(jnp.square(v - mu), axis=-1, keepdims=True)
        return (v - mu) * lax.rsqrt(var + eps) * g + b

    def attention(q, k, v, bias):
        # q: (Sq, D)  k, v: (Sk, D) -- heads packed head-major along lanes
        # bias: (Sq, Sk) additive mask (0 / -1e10)
        # Per-head scores, stacked along sublanes so bias-add + softmax run once.
        e_heads = []
        for h in range(H):
            qh = q[:, h * dk:(h + 1) * dk]
            kh = k[:, h * dk:(h + 1) * dk]
            eh = lax.dot_general(qh, kh, (((1,), (1,)), ((), ())),
                                 preferred_element_type=jnp.float32)
            e_heads.append(eh * inv_scale + bias)
        e = jnp.concatenate(e_heads, axis=0)                      # (H*Sq, Sk)
        m = jnp.max(e, axis=-1, keepdims=True)
        p = jnp.exp(e - m)
        # approx reciprocal (EUP): ~1e-6 rel. error vs exact divide; documented.
        alpha = p * pl.reciprocal(jnp.sum(p, axis=-1, keepdims=True), approx=True)
        ctx = []
        for h in range(H):
            ah = alpha[h * Sq:(h + 1) * Sq, :]
            vh = v[:, h * dk:(h + 1) * dk]
            ctx.append(jnp.dot(ah, vh, preferred_element_type=jnp.float32))
        return jnp.concatenate(ctx, axis=-1)                      # (Sq, H*dk == D)

    # static unroll over layers (L is small here; see TODO at top for large L)
    for l in range(n_layers):
        vec = vec_ref[l]                                          # (13, lane_w)

        def vrow(r, w, _vec=vec):
            return _vec[r:r + 1, 0:w]                             # (1, w)

        # --- DecoderBlock: masked self-attention + residual LayerNorm ---
        qkv = mm(x, sa_wqkv_ref[l]) + vrow(_ROW_SA_BQKV, 3 * D)   # one merged matmul
        attn = attention(qkv[:, 0:D], qkv[:, D:2 * D], qkv[:, 2 * D:3 * D], tb)
        attn = mm(attn, sa_wo_ref[l]) + vrow(_ROW_SA_BO, D)       # single out-proj
        q = layer_norm(attn + x, vrow(_ROW_NORM_G, D), vrow(_ROW_NORM_B, D))

        # --- TransformerBlock: encoder-decoder attention + residual LayerNorm ---
        qp = mm(q, ca_wq_ref[l]) + vrow(_ROW_CA_BQ, D)
        kv = mm(enc, ca_wkv_ref[l]) + vrow(_ROW_CA_BKV, 2 * D)    # merged K|V matmul
        attn2 = attention(qp, kv[:, 0:D], kv[:, D:2 * D], sb)
        attn2 = mm(attn2, ca_wo_ref[l]) + vrow(_ROW_CA_BO, D)
        x1 = layer_norm(attn2 + q, vrow(_ROW_L1G, D), vrow(_ROW_L1B, D))

        # --- FFN (Linear -> LeakyReLU(0.01) -> Linear) + residual LayerNorm ---
        hmid = mm(x1, fw1_ref[l]) + vrow(_ROW_FB1, d_ff)
        hmid = jnp.where(hmid > 0.0, hmid, 0.01 * hmid)
        f = mm(hmid, fw2_ref[l]) + vrow(_ROW_FB2, D)
        x = layer_norm(f + x1, vrow(_ROW_L2G, D), vrow(_ROW_L2B, D))

    # final vocab projection, lane-dense (vocab padded to a multiple of 128)
    o_ref[0] = mm(x, fcw_ref[...]) + fcb_ref[...]


# ----------------------------- parameter packing -----------------------------

def pack_decoder_params(params, n_head, v_pad, use_bf16=False):
    """Pre-transpose / merge / slab-pack all weights in plain JAX (layout plumbing)."""
    D = params["WE"].shape[1]
    wdt = jnp.bfloat16 if use_bf16 else jnp.float32

    d_ff = params["layers"][0]["ffn"]["w1"].shape[0]
    max_w = max(3 * D, 2 * D, d_ff, D, 128)
    lane_w = ((max_w + 127) // 128) * 128

    def row_slab(vectors):
        slab = jnp.zeros((_N_VEC_ROWS, lane_w), jnp.float32)
        for r, v in enumerate(vectors):
            v = jnp.reshape(v, (-1,)).astype(jnp.float32)
            slab = slab.at[r, :v.shape[0]].set(v)
        return slab

    w_qkv, w_o_self, w_q_c, w_kv_c, w_o_c, w_f1, w_f2, vec_slabs = ([] for _ in range(8))
    for lyr in params["layers"]:
        sa, ca, ffn = lyr["self_mha"], lyr["tb_mha"], lyr["ffn"]
        # torch Linear W:(out,in), y = x @ W.T + b  ->  keep columns head-major
        w_qkv.append(jnp.concatenate([sa["wq"].T, sa["wk"].T, sa["wv"].T], axis=1))
        w_o_self.append(sa["wo"].T)
        w_q_c.append(ca["wq"].T)
        w_kv_c.append(jnp.concatenate([ca["wk"].T, ca["wv"].T], axis=1))
        w_o_c.append(ca["wo"].T)
        w_f1.append(ffn["w1"].T)
        w_f2.append(ffn["w2"].T)
        vec_slabs.append(row_slab([
            jnp.concatenate([sa["bq"].ravel(), sa["bk"].ravel(), sa["bv"].ravel()]),
            sa["bo"].ravel(),
            lyr["norm_g"].ravel(), lyr["norm_b"].ravel(),
            ca["bq"].ravel(),
            jnp.concatenate([ca["bk"].ravel(), ca["bv"].ravel()]),
            ca["bo"].ravel(),
            lyr["ln1_g"].ravel(), lyr["ln1_b"].ravel(),
            ffn["b1"].ravel(), ffn["b2"].ravel(),
            lyr["ln2_g"].ravel(), lyr["ln2_b"].ravel(),
        ]))

    def stack(xs, dt):
        return jnp.stack(xs, axis=0).astype(dt)

    weights = [stack(w_qkv, wdt), stack(w_o_self, wdt),
               stack(w_q_c, wdt), stack(w_kv_c, wdt), stack(w_o_c, wdt),
               stack(w_f1, wdt), stack(w_f2, wdt)]
    vec = jnp.stack(vec_slabs, axis=0)                         # (L, 13, lane_w) f32

    V = params["fc_w"].shape[0]
    fcw = jnp.zeros((D, v_pad), jnp.float32).at[:, :V].set(params["fc_w"].T).astype(wdt)
    fcb = jnp.zeros((1, v_pad), jnp.float32).at[:, :V].set(params["fc_b"].ravel())
    return weights + [vec, fcw, fcb]


# ----------------------------- Decoder forward -----------------------------

def decoder_forward(params, tokens, enc_out, source_mask, target_mask, *,
                    n_head, use_bf16_matmul=False):
    """Mirrors Decoder.forward (eval mode: dropout = identity)."""
    B, Sq = tokens.shape
    D = params["WE"].shape[1]
    V = params["fc_w"].shape[0]
    Sk = enc_out.shape[1]
    L = len(params["layers"])
    dk = D // n_head
    v_pad = ((V + 127) // 128) * 128

    # Embedding gathers are glue; everything else runs inside one Pallas kernel.
    scale = jnp.sqrt(jnp.float32(D))
    pos = jnp.arange(Sq)
    x = (params["WE"][tokens] * scale + params["PE"][pos][None, :, :]).astype(jnp.float32)

    # additive attention biases: keep -> 0, masked -> -1e10
    tgt_bias = (target_mask.astype(jnp.float32) - 1.0) * 1e10
    src_bias = (source_mask.astype(jnp.float32) - 1.0) * 1e10

    flat = pack_decoder_params(params, n_head, v_pad, use_bf16=use_bf16_matmul)

    def act_spec(rows, cols):
        return pl.BlockSpec((1, rows, cols), lambda b: (b, 0, 0))

    def full_spec(a):
        return pl.BlockSpec(a.shape, lambda b, _nd=a.ndim: (0,) * _nd)

    kernel = functools.partial(_decoder_kernel, n_layers=L, n_head=n_head,
                               d_k=dk, eps=1e-5)

    # NOTE(v7x): at larger D / L / vocab, set vmem_limit_bytes and stream weights
    # per layer (grid over L, "arbitrary", pl.Buffered(2)); at these sizes the
    # fully-resident design uses ~100 KB of VMEM and needs no special handling.
    logits_padded = pl.pallas_call(
        kernel,
        out_shape=jax.ShapeDtypeStruct((B, Sq, v_pad), jnp.float32),
        grid=(B,),
        in_specs=[act_spec(Sq, D), act_spec(Sk, D),
                  act_spec(Sq, Sq), act_spec(Sq, Sk)]
                 + [full_spec(a) for a in flat],
        out_specs=pl.BlockSpec((1, Sq, v_pad), lambda b: (b, 0, 0)),
        compiler_params=pltpu.CompilerParams(
            dimension_semantics=("parallel",)),   # batch axis -> both TCs on v7x
    )(x, enc_out.astype(jnp.float32), tgt_bias, src_bias, *flat)

    return logits_padded[:, :, :V]


# ----------------------------- parameter init -----------------------------

def _init_linear(key, out_dim, in_dim):
    k1, k2 = jax.random.split(key)
    w = jax.random.normal(k1, (out_dim, in_dim), jnp.float32) * 0.05
    b = jax.random.normal(k2, (1, out_dim), jnp.float32) * 0.01
    return w, b


def _init_mha(key, d_model):
    ks = jax.random.split(key, 4)
    wq, bq = _init_linear(ks[0], d_model, d_model)
    wk, bk = _init_linear(ks[1], d_model, d_model)
    wv, bv = _init_linear(ks[2], d_model, d_model)
    wo, bo = _init_linear(ks[3], d_model, d_model)
    return dict(wq=wq, bq=bq, wk=wk, bk=bk, wv=wv, bv=bv, wo=wo, bo=bo)


def init_decoder_params(key, vocab, max_len, d_model, n_layers, forward_expansion):
    keys = jax.random.split(key, 3 + n_layers)
    params = {
        "WE": jax.random.normal(keys[0], (vocab, d_model), jnp.float32) * 0.05,
        "PE": jax.random.normal(keys[1], (max_len, d_model), jnp.float32) * 0.05,
        "layers": [],
    }
    for i in range(n_layers):
        lks = jax.random.split(keys[2 + i], 4)
        w1, b1 = _init_linear(lks[2], forward_expansion * d_model, d_model)
        w2, b2 = _init_linear(lks[3], d_model, forward_expansion * d_model)
        params["layers"].append(dict(
            self_mha=_init_mha(lks[0], d_model),
            tb_mha=_init_mha(lks[1], d_model),
            norm_g=jnp.ones((1, d_model), jnp.float32),
            norm_b=jnp.zeros((1, d_model), jnp.float32),
            ln1_g=jnp.ones((1, d_model), jnp.float32),
            ln1_b=jnp.zeros((1, d_model), jnp.float32),
            ln2_g=jnp.ones((1, d_model), jnp.float32),
            ln2_b=jnp.zeros((1, d_model), jnp.float32),
            ffn=dict(w1=w1, b1=b1, w2=w2, b2=b2),
        ))
    fw, fb = _init_linear(keys[-1], vocab, d_model)
    params["fc_w"], params["fc_b"] = fw, fb
    return params


# ----------------------------- main -----------------------------

if __name__ == "__main__":
    B, S_tgt, S_src = 2, 8, 8
    D, n_heads, n_layers, fwd_exp = 32, 4, 2, 2
    target_vocab_size, max_len = 23, 16

    key = jax.random.PRNGKey(0)
    kp, kt, ke = jax.random.split(key, 3)

    params = init_decoder_params(kp, target_vocab_size, max_len, D, n_layers, fwd_exp)

    tokens = jax.random.randint(kt, (B, S_tgt), 0, target_vocab_size, dtype=jnp.int32)
    enc_out = jax.random.normal(ke, (B, S_src, D), jnp.float32)

    # target mask: causal (look-ahead) mask broadcast to (B, S_tgt, S_tgt)
    target_mask = jnp.broadcast_to(
        jnp.tril(jnp.ones((S_tgt, S_tgt), jnp.float32)), (B, S_tgt, S_tgt))
    # source mask: key-padding mask (batch 1 has 2 padded encoder positions)
    src_lens = jnp.array([S_src, S_src - 2])
    key_mask = (jnp.arange(S_src)[None, :] < src_lens[:, None]).astype(jnp.float32)
    source_mask = jnp.broadcast_to(key_mask[:, None, :], (B, S_tgt, S_src))

    fwd = jax.jit(functools.partial(decoder_forward, n_head=n_heads))
    logits = fwd(params, tokens, enc_out, source_mask, target_mask)
    jax.block_until_ready(logits)
    assert logits.shape == (B, S_tgt, target_vocab_size)
    print("KERNEL_OK")
</pallas_src>

<mosaic_0001>
module attributes {stable_mosaic.version = 11 : i64} {
  func.func @_decoder_kernel(%arg0: i32, %arg1: memref<1x8x32xf32, #tpu.memory_space<vmem>>, %arg2: memref<1x8x32xf32, #tpu.memory_space<vmem>>, %arg3: memref<1x8x8xf32, #tpu.memory_space<vmem>>, %arg4: memref<1x8x8xf32, #tpu.memory_space<vmem>>, %arg5: memref<2x32x96xf32, #tpu.memory_space<vmem>>, %arg6: memref<2x32x32xf32, #tpu.memory_space<vmem>>, %arg7: memref<2x32x32xf32, #tpu.memory_space<vmem>>, %arg8: memref<2x32x64xf32, #tpu.memory_space<vmem>>, %arg9: memref<2x32x32xf32, #tpu.memory_space<vmem>>, %arg10: memref<2x32x64xf32, #tpu.memory_space<vmem>>, %arg11: memref<2x64x32xf32, #tpu.memory_space<vmem>>, %arg12: memref<2x13x128xf32, #tpu.memory_space<vmem>>, %arg13: memref<32x128xf32, #tpu.memory_space<vmem>>, %arg14: memref<1x128xf32, #tpu.memory_space<vmem>>, %arg15: memref<1x8x128xf32, #tpu.memory_space<vmem>>) attributes {dimension_semantics = [#tpu.dimension_semantics<parallel>], iteration_bounds = array<i64: 2>, scalar_prefetch = 0 : i64, scratch_operands = 0 : i64, tpu.core_type = #tpu.core_type<tc>, window_params = [{transform_indices = @transform_0, window_bounds = array<i64: 1, 8, 32>}, {transform_indices = @transform_1, window_bounds = array<i64: 1, 8, 32>}, {transform_indices = @transform_2, window_bounds = array<i64: 1, 8, 8>}, {transform_indices = @transform_3, window_bounds = array<i64: 1, 8, 8>}, {pipeline_mode = #tpu.pipeline_mode<synchronous>, transform_indices = @transform_4, window_bounds = array<i64: 2, 32, 96>}, {pipeline_mode = #tpu.pipeline_mode<synchronous>, transform_indices = @transform_5, window_bounds = array<i64: 2, 32, 32>}, {pipeline_mode = #tpu.pipeline_mode<synchronous>, transform_indices = @transform_6, window_bounds = array<i64: 2, 32, 32>}, {pipeline_mode = #tpu.pipeline_mode<synchronous>, transform_indices = @transform_7, window_bounds = array<i64: 2, 32, 64>}, {pipeline_mode = #tpu.pipeline_mode<synchronous>, transform_indices = @transform_8, window_bounds = array<i64: 2, 32, 32>}, {pipeline_mode = #tpu.pipeline_mode<synchronous>, transform_indices = @transform_9, window_bounds = array<i64: 2, 32, 64>}, {pipeline_mode = #tpu.pipeline_mode<synchronous>, transform_indices = @transform_10, window_bounds = array<i64: 2, 64, 32>}, {pipeline_mode = #tpu.pipeline_mode<synchronous>, transform_indices = @transform_11, window_bounds = array<i64: 2, 13, 128>}, {pipeline_mode = #tpu.pipeline_mode<synchronous>, transform_indices = @transform_12, window_bounds = array<i64: 32, 128>}, {pipeline_mode = #tpu.pipeline_mode<synchronous>, transform_indices = @transform_13, window_bounds = array<i64: 1, 128>}, {transform_indices = @transform_14, window_bounds = array<i64: 1, 8, 128>}]} {
    %c0 = arith.constant 0 : index
    %c0_0 = arith.constant 0 : index
    %c0_1 = arith.constant 0 : index
    %0 = vector.load %arg1[%c0, %c0_0, %c0_1] : memref<1x8x32xf32, #tpu.memory_space<vmem>>, vector<1x8x32xf32>
    %1 = vector.shape_cast %0 : vector<1x8x32xf32> to vector<8x32xf32>
    %c0_2 = arith.constant 0 : index
    %c0_3 = arith.constant 0 : index
    %c0_4 = arith.constant 0 : index
    %2 = vector.load %arg2[%c0_2, %c0_3, %c0_4] : memref<1x8x32xf32, #tpu.memory_space<vmem>>, vector<1x8x32xf32>
    %3 = vector.shape_cast %2 : vector<1x8x32xf32> to vector<8x32xf32>
    %c0_5 = arith.constant 0 : index
    %c0_6 = arith.constant 0 : index
    %c0_7 = arith.constant 0 : index
    %4 = vector.load %arg3[%c0_5, %c0_6, %c0_7] : memref<1x8x8xf32, #tpu.memory_space<vmem>>, vector<1x8x8xf32>
    %5 = vector.shape_cast %4 : vector<1x8x8xf32> to vector<8x8xf32>
    %c0_8 = arith.constant 0 : index
    %c0_9 = arith.constant 0 : index
    %c0_10 = arith.constant 0 : index
    %6 = vector.load %arg4[%c0_8, %c0_9, %c0_10] : memref<1x8x8xf32, #tpu.memory_space<vmem>>, vector<1x8x8xf32>
    %7 = vector.shape_cast %6 : vector<1x8x8xf32> to vector<8x8xf32>
    %c0_11 = arith.constant 0 : index
    %c0_12 = arith.constant 0 : index
    %c0_13 = arith.constant 0 : index
    %8 = vector.load %arg12[%c0_11, %c0_12, %c0_13] : memref<2x13x128xf32, #tpu.memory_space<vmem>>, vector<1x13x128xf32>
    %9 = vector.shape_cast %8 : vector<1x13x128xf32> to vector<13x128xf32>
    %c0_14 = arith.constant 0 : index
    %c0_15 = arith.constant 0 : index
    %c0_16 = arith.constant 0 : index
    %10 = vector.load %arg5[%c0_14, %c0_15, %c0_16] : memref<2x32x96xf32, #tpu.memory_space<vmem>>, vector<1x32x96xf32>
    %11 = vector.shape_cast %10 : vector<1x32x96xf32> to vector<32x96xf32>
    %cst = arith.constant dense<0.000000e+00> : vector<8x96xf32>
    %12 = tpu.matmul %1, %11, %cst {dimension_numbers = #tpu.dot_dimension_numbers<[1], [0], [0], [1], [0, 0, 1, 1], [], []>} : vector<8x32xf32>, vector<32x96xf32>, vector<8x96xf32> -> vector<8x96xf32>
    %13 = vector.extract_strided_slice %9 {offsets = [0, 0], sizes = [1, 96], strides = [1, 1]} : vector<13x128xf32> to vector<1x96xf32>
    %14 = vector.broadcast %13 : vector<1x96xf32> to vector<8x96xf32>
    %15 = arith.addf %12, %14 : vector<8x96xf32>
    %16 = vector.extract_strided_slice %15 {offsets = [0, 0], sizes = [8, 32], strides = [1, 1]} : vector<8x96xf32> to vector<8x32xf32>
    %17 = vector.extract_strided_slice %15 {offsets = [0, 32], sizes = [8, 32], strides = [1, 1]} : vector<8x96xf32> to vector<8x32xf32>
    %18 = vector.extract_strided_slice %15 {offsets = [0, 64], sizes = [8, 32], strides = [1, 1]} : vector<8x96xf32> to vector<8x32xf32>
    %19 = vector.extract_strided_slice %16 {offsets = [0, 0], sizes = [8, 8], strides = [1, 1]} : vector<8x32xf32> to vector<8x8xf32>
    %20 = vector.extract_strided_slice %17 {offsets = [0, 0], sizes = [8, 8], strides = [1, 1]} : vector<8x32xf32> to vector<8x8xf32>
    %cst_17 = arith.constant dense<0.000000e+00> : vector<8x8xf32>
    %21 = tpu.matmul %19, %20, %cst_17 {dimension_numbers = #tpu.dot_dimension_numbers<[1], [1], [0], [0], [0, 0, 1, 0], [], []>} : vector<8x8xf32>, vector<8x8xf32>, vector<8x8xf32> -> vector<8x8xf32>
    %cst_18 = arith.constant 0.353553385 : f32
    %22 = vector.broadcast %cst_18 : f32 to vector<8x8xf32>
    %23 = arith.mulf %21, %22 : vector<8x8xf32>
    %24 = arith.addf %23, %5 : vector<8x8xf32>
    %25 = vector.extract_strided_slice %16 {offsets = [0, 8], sizes = [8, 8], strides = [1, 1]} : vector<8x32xf32> to vector<8x8xf32>
    %26 = vector.extract_strided_slice %17 {offsets = [0, 8], sizes = [8, 8], strides = [1, 1]} : vector<8x32xf32> to vector<8x8xf32>
    %cst_19 = arith.constant dense<0.000000e+00> : vector<8x8xf32>
    %27 = tpu.matmul %25, %26, %cst_19 {dimension_numbers = #tpu.dot_dimension_numbers<[1], [1], [0], [0], [0, 0, 1, 0], [], []>} : vector<8x8xf32>, vector<8x8xf32>, vector<8x8xf32> -> vector<8x8xf32>
    %cst_20 = arith.constant 0.353553385 : f32
    %28 = vector.broadcast %cst_20 : f32 to vector<8x8xf32>
    %29 = arith.mulf %27, %28 : vector<8x8xf32>
    %30 = arith.addf %29, %5 : vector<8x8xf32>
    %31 = vector.extract_strided_slice %16 {offsets = [0, 16], sizes = [8, 8], strides = [1, 1]} : vector<8x32xf32> to vector<8x8xf32>
    %32 = vector.extract_strided_slice %17 {offsets = [0, 16], sizes = [8, 8], strides = [1, 1]} : vector<8x32xf32> to vector<8x8xf32>
    %cst_21 = arith.constant dense<0.000000e+00> : vector<8x8xf32>
    %33 = tpu.matmul %31, %32, %cst_21 {dimension_numbers = #tpu.dot_dimension_numbers<[1], [1], [0], [0], [0, 0, 1, 0], [], []>} : vector<8x8xf32>, vector<8x8xf32>, vector<8x8xf32> -> vector<8x8xf32>
    %cst_22 = arith.constant 0.353553385 : f32
    %34 = vector.broadcast %cst_22 : f32 to vector<8x8xf32>
    %35 = arith.mulf %33, %34 : vector<8x8xf32>
    %36 = arith.addf %35, %5 : vector<8x8xf32>
    %37 = vector.extract_strided_slice %16 {offsets = [0, 24], sizes = [8, 8], strides = [1, 1]} : vector<8x32xf32> to vector<8x8xf32>
    %38 = vector.extract_strided_slice %17 {offsets = [0, 24], sizes = [8, 8], strides = [1, 1]} : vector<8x32xf32> to vector<8x8xf32>
    %cst_23 = arith.constant dense<0.000000e+00> : vector<8x8xf32>
    %39 = tpu.matmul %37, %38, %cst_23 {dimension_numbers = #tpu.dot_dimension_numbers<[1], [1], [0], [0], [0, 0, 1, 0], [], []>} : vector<8x8xf32>, vector<8x8xf32>, vector<8x8xf32> -> vector<8x8xf32>
    %cst_24 = arith.constant 0.353553385 : f32
    %40 = vector.broadcast %cst_24 : f32 to vector<8x8xf32>
    %41 = arith.mulf %39, %40 : vector<8x8xf32>
    %42 = arith.addf %41, %5 : vector<8x8xf32>
    %43 = tpu.concatenate %24, %30, %36, %42 in 0 : vector<8x8xf32>, vector<8x8xf32>, vector<8x8xf32>, vector<8x8xf32> -> vector<32x8xf32>
    %cst_25 = arith.constant dense<0xFF800000> : vector<32xf32>
    %44 = vector.multi_reduction <maximumf>, %43, %cst_25 [1] : vector<32x8xf32> to vector<32xf32>
    %45 = vector.shape_cast %44 : vector<32xf32> to vector<32x1xf32>
    %46 = vector.broadcast %45 : vector<32x1xf32> to vector<32x8xf32>
    %47 = arith.subf %43, %46 : vector<32x8xf32>
    %48 = math.exp %47 : vector<32x8xf32>
    %cst_26 = arith.constant dense<0.000000e+00> : vector<32xf32>
    %49 = vector.multi_reduction <add>, %48, %cst_26 [1] : vector<32x8xf32> to vector<32xf32>
    %50 = vector.shape_cast %49 : vector<32xf32> to vector<32x1xf32>
    %51 = tpu.reciprocal %50 {approx = true} : vector<32x1xf32> -> vector<32x1xf32>
    %52 = vector.broadcast %51 : vector<32x1xf32> to vector<32x8xf32>
    %53 = arith.mulf %48, %52 : vector<32x8xf32>
    %54 = vector.extract_strided_slice %53 {offsets = [0, 0], sizes = [8, 8], strides = [1, 1]} : vector<32x8xf32> to vector<8x8xf32>
    %55 = vector.extract_strided_slice %18 {offsets = [0, 0], sizes = [8, 8], strides = [1, 1]} : vector<8x32xf32> to vector<8x8xf32>
    %cst_27 = arith.constant dense<0.000000e+00> : vector<8x8xf32>
    %56 = tpu.matmul %54, %55, %cst_27 {dimension_numbers = #tpu.dot_dimension_numbers<[1], [0], [0], [1], [0, 0, 1, 1], [], []>} : vector<8x8xf32>, vector<8x8xf32>, vector<8x8xf32> -> vector<8x8xf32>
    %57 = vector.extract_strided_slice %53 {offsets = [8, 0], sizes = [8, 8], strides = [1, 1]} : vector<32x8xf32> to vector<8x8xf32>
    %58 = vector.extract_strided_slice %18 {offsets = [0, 8], sizes = [8, 8], strides = [1, 1]} : vector<8x32xf32> to vector<8x8xf32>
    %cst_28 = arith.constant dense<0.000000e+00> : vector<8x8xf32>
    %59 = tpu.matmul %57, %58, %cst_28 {dimension_numbers = #tpu.dot_dimension_numbers<[1], [0], [0], [1], [0, 0, 1, 1], [], []>} : vector<8x8xf32>, vector<8x8xf32>, vector<8x8xf32> -> vector<8x8xf32>
    %60 = vector.extract_strided_slice %53 {offsets = [16, 0], sizes = [8, 8], strides = [1, 1]} : vector<32x8xf32> to vector<8x8xf32>
    %61 = vector.extract_strided_slice %18 {offsets = [0, 16], sizes = [8, 8], strides = [1, 1]} : vector<8x32xf32> to vector<8x8xf32>
    %cst_29 = arith.constant dense<0.000000e+00> : vector<8x8xf32>
    %62 = tpu.matmul %60, %61, %cst_29 {dimension_numbers = #tpu.dot_dimension_numbers<[1], [0], [0], [1], [0, 0, 1, 1], [], []>} : vector<8x8xf32>, vector<8x8xf32>, vector<8x8xf32> -> vector<8x8xf32>
    %63 = vector.extract_strided_slice %53 {offsets = [24, 0], sizes = [8, 8], strides = [1, 1]} : vector<32x8xf32> to vector<8x8xf32>
    %64 = vector.extract_strided_slice %18 {offsets = [0, 24], sizes = [8, 8], strides = [1, 1]} : vector<8x32xf32> to vector<8x8xf32>
    %cst_30 = arith.constant dense<0.000000e+00> : vector<8x8xf32>
    %65 = tpu.matmul %63, %64, %cst_30 {dimension_numbers = #tpu.dot_dimension_numbers<[1], [0], [0], [1], [0, 0, 1, 1], [], []>} : vector<8x8xf32>, vector<8x8xf32>, vector<8x8xf32> -> vector<8x8xf32>
    %66 = tpu.concatenate %56, %59, %62, %65 in 1 : vector<8x8xf32>, vector<8x8xf32>, vector<8x8xf32>, vector<8x8xf32> -> vector<8x32xf32>
    %c0_31 = arith.constant 0 : index
    %c0_32 = arith.constant 0 : index
    %c0_33 = arith.constant 0 : index
    %67 = vector.load %arg6[%c0_31, %c0_32, %c0_33] : memref<2x32x32xf32, #tpu.memory_space<vmem>>, vector<1x32x32xf32>
    %68 = vector.shape_cast %67 : vector<1x32x32xf32> to vector<32x32xf32>
    %cst_34 = arith.constant dense<0.000000e+00> : vector<8x32xf32>
    %69 = tpu.matmul %66, %68, %cst_34 {dimension_numbers = #tpu.dot_dimension_numbers<[1], [0], [0], [1], [0, 0, 1, 1], [], []>} : vector<8x32xf32>, vector<32x32xf32>, vector<8x32xf32> -> vector<8x32xf32>
    %70 = vector.extract_strided_slice %9 {offsets = [1, 0], sizes = [1, 32], strides = [1, 1]} : vector<13x128xf32> to vector<1x32xf32>
    %71 = vector.broadcast %70 : vector<1x32xf32> to vector<8x32xf32>
    %72 = arith.addf %69, %71 : vector<8x32xf32>
    %73 = arith.addf %72, %1 : vector<8x32xf32>
    %74 = vector.extract_strided_slice %9 {offsets = [2, 0], sizes = [1, 32], strides = [1, 1]} : vector<13x128xf32> to vector<1x32xf32>
    %75 = vector.extract_strided_slice %9 {offsets = [3, 0], sizes = [1, 32], strides = [1, 1]} : vector<13x128xf32> to vector<1x32xf32>
    %cst_35 = arith.constant dense<0.000000e+00> : vector<8xf32>
    %76 = vector.multi_reduction <add>, %73, %cst_35 [1] : vector<8x32xf32> to vector<8xf32>
    %77 = vector.shape_cast %76 : vector<8xf32> to vector<8x1xf32>
    %cst_36 = arith.constant 3.200000e+01 : f32
    %78 = vector.broadcast %cst_36 : f32 to vector<8x1xf32>
    %79 = arith.divf %77, %78 : vector<8x1xf32>
    %80 = vector.broadcast %79 : vector<8x1xf32> to vector<8x32xf32>
    %81 = arith.subf %73, %80 : vector<8x32xf32>
    %82 = arith.mulf %81, %81 : vector<8x32xf32>
    %cst_37 = arith.constant dense<0.000000e+00> : vector<8xf32>
    %83 = vector.multi_reduction <add>, %82, %cst_37 [1] : vector<8x32xf32> to vector<8xf32>
    %84 = vector.shape_cast %83 : vector<8xf32> to vector<8x1xf32>
    %cst_38 = arith.constant 3.200000e+01 : f32
    %85 = vector.broadcast %cst_38 : f32 to vector<8x1xf32>
    %86 = arith.divf %84, %85 : vector<8x1xf32>
    %87 = vector.broadcast %79 : vector<8x1xf32> to vector<8x32xf32>
    %88 = arith.subf %73, %87 : vector<8x32xf32>
    %cst_39 = arith.constant 9.99999974E-6 : f32
    %89 = vector.broadcast %cst_39 : f32 to vector<8x1xf32>
    %90 = arith.addf %86, %89 : vector<8x1xf32>
    %91 = math.rsqrt %90 : vector<8x1xf32>
    %92 = vector.broadcast %91 : vector<8x1xf32> to vector<8x32xf32>
    %93 = arith.mulf %88, %92 : vector<8x32xf32>
    %94 = vector.broadcast %74 : vector<1x32xf32> to vector<8x32xf32>
    %95 = arith.mulf %93, %94 : vector<8x32xf32>
    %96 = vector.broadcast %75 : vector<1x32xf32> to vector<8x32xf32>
    %97 = arith.addf %95, %96 : vector<8x32xf32>
    %c0_40 = arith.constant 0 : index
    %c0_41 = arith.constant 0 : index
    %c0_42 = arith.constant 0 : index
    %98 = vector.load %arg7[%c0_40, %c0_41, %c0_42] : memref<2x32x32xf32, #tpu.memory_space<vmem>>, vector<1x32x32xf32>
    %99 = vector.shape_cast %98 : vector<1x32x32xf32> to vector<32x32xf32>
    %cst_43 = arith.constant dense<0.000000e+00> : vector<8x32xf32>
    %100 = tpu.matmul %97, %99, %cst_43 {dimension_numbers = #tpu.dot_dimension_numbers<[1], [0], [0], [1], [0, 0, 1, 1], [], []>} : vector<8x32xf32>, vector<32x32xf32>, vector<8x32xf32> -> vector<8x32xf32>
    %101 = vector.extract_strided_slice %9 {offsets = [4, 0], sizes = [1, 32], strides = [1, 1]} : vector<13x128xf32> to vector<1x32xf32>
    %102 = vector.broadcast %101 : vector<1x32xf32> to vector<8x32xf32>
    %103 = arith.addf %100, %102 : vector<8x32xf32>
    %c0_44 = arith.constant 0 : index
    %c0_45 = arith.constant 0 : index
    %c0_46 = arith.constant 0 : index
    %104 = vector.load %arg8[%c0_44, %c0_45, %c0_46] : memref<2x32x64xf32, #tpu.memory_space<vmem>>, vector<1x32x64xf32>
    %105 = vector.shape_cast %104 : vector<1x32x64xf32> to vector<32x64xf32>
    %cst_47 = arith.constant dense<0.000000e+00> : vector<8x64xf32>
    %106 = tpu.matmul %3, %105, %cst_47 {dimension_numbers = #tpu.dot_dimension_numbers<[1], [0], [0], [1], [0, 0, 1, 1], [], []>} : vector<8x32xf32>, vector<32x64xf32>, vector<8x64xf32> -> vector<8x64xf32>
    %107 = vector.extract_strided_slice %9 {offsets = [5, 0], sizes = [1, 64], strides = [1, 1]} : vector<13x128xf32> to vector<1x64xf32>
    %108 = vector.broadcast %107 : vector<1x64xf32> to vector<8x64xf32>
    %109 = arith.addf %106, %108 : vector<8x64xf32>
    %110 = vector.extract_strided_slice %109 {offsets = [0, 0], sizes = [8, 32], strides = [1, 1]} : vector<8x64xf32> to vector<8x32xf32>
    %111 = vector.extract_strided_slice %109 {offsets = [0, 32], sizes = [8, 32], strides = [1, 1]} : vector<8x64xf32> to vector<8x32xf32>
    %112 = vector.extract_strided_slice %103 {offsets = [0, 0], sizes = [8, 8], strides = [1, 1]} : vector<8x32xf32> to vector<8x8xf32>
    %113 = vector.extract_strided_slice %110 {offsets = [0, 0], sizes = [8, 8], strides = [1, 1]} : vector<8x32xf32> to vector<8x8xf32>
    %cst_48 = arith.constant dense<0.000000e+00> : vector<8x8xf32>
    %114 = tpu.matmul %112, %113, %cst_48 {dimension_numbers = #tpu.dot_dimension_numbers<[1], [1], [0], [0], [0, 0, 1, 0], [], []>} : vector<8x8xf32>, vector<8x8xf32>, vector<8x8xf32> -> vector<8x8xf32>
    %cst_49 = arith.constant 0.353553385 : f32
    %115 = vector.broadcast %cst_49 : f32 to vector<8x8xf32>
    %116 = arith.mulf %114, %115 : vector<8x8xf32>
    %117 = arith.addf %116, %7 : vector<8x8xf32>
    %118 = vector.extract_strided_slice %103 {offsets = [0, 8], sizes = [8, 8], strides = [1, 1]} : vector<8x32xf32> to vector<8x8xf32>
    %119 = vector.extract_strided_slice %110 {offsets = [0, 8], sizes = [8, 8], strides = [1, 1]} : vector<8x32xf32> to vector<8x8xf32>
    %cst_50 = arith.constant dense<0.000000e+00> : vector<8x8xf32>
    %120 = tpu.matmul %118, %119, %cst_50 {dimension_numbers = #tpu.dot_dimension_numbers<[1], [1], [0], [0], [0, 0, 1, 0], [], []>} : vector<8x8xf32>, vector<8x8xf32>, vector<8x8xf32> -> vector<8x8xf32>
    %cst_51 = arith.constant 0.353553385 : f32
    %121 = vector.broadcast %cst_51 : f32 to vector<8x8xf32>
    %122 = arith.mulf %120, %121 : vector<8x8xf32>
    %123 = arith.addf %122, %7 : vector<8x8xf32>
    %124 = vector.extract_strided_slice %103 {offsets = [0, 16], sizes = [8, 8], strides = [1, 1]} : vector<8x32xf32> to vector<8x8xf32>
    %125 = vector.extract_strided_slice %110 {offsets = [0, 16], sizes = [8, 8], strides = [1, 1]} : vector<8x32xf32> to vector<8x8xf32>
    %cst_52 = arith.constant dense<0.000000e+00> : vector<8x8xf32>
    %126 = tpu.matmul %124, %125, %cst_52 {dimension_numbers = #tpu.dot_dimension_numbers<[1], [1], [0], [0], [0, 0, 1, 0], [], []>} : vector<8x8xf32>, vector<8x8xf32>, vector<8x8xf32> -> vector<8x8xf32>
    %cst_53 = arith.constant 0.353553385 : f32
    %127 = vector.broadcast %cst_53 : f32 to vector<8x8xf32>
    %128 = arith.mulf %126, %127 : vector<8x8xf32>
    %129 = arith.addf %128, %7 : vector<8x8xf32>
    %130 = vector.extract_strided_slice %103 {offsets = [0, 24], sizes = [8, 8], strides = [1, 1]} : vector<8x32xf32> to vector<8x8xf32>
    %131 = vector.extract_strided_slice %110 {offsets = [0, 24], sizes = [8, 8], strides = [1, 1]} : vector<8x32xf32> to vector<8x8xf32>
    %cst_54 = arith.constant dense<0.000000e+00> : vector<8x8xf32>
    %132 = tpu.matmul %130, %131, %cst_54 {dimension_numbers = #tpu.dot_dimension_numbers<[1], [1], [0], [0], [0, 0, 1, 0], [], []>} : vector<8x8xf32>, vector<8x8xf32>, vector<8x8xf32> -> vector<8x8xf32>
    %cst_55 = arith.constant 0.353553385 : f32
    %133 = vector.broadcast %cst_55 : f32 to vector<8x8xf32>
    %134 = arith.mulf %132, %133 : vector<8x8xf32>
    %135 = arith.addf %134, %7 : vector<8x8xf32>
    %136 = tpu.concatenate %117, %123, %129, %135 in 0 : vector<8x8xf32>, vector<8x8xf32>, vector<8x8xf32>, vector<8x8xf32> -> vector<32x8xf32>
    %cst_56 = arith.constant dense<0xFF800000> : vector<32xf32>
    %137 = vector.multi_reduction <maximumf>, %136, %cst_56 [1] : vector<32x8xf32> to vector<32xf32>
    %138 = vector.shape_cast %137 : vector<32xf32> to vector<32x1xf32>
    %139 = vector.broadcast %138 : vector<32x1xf32> to vector<32x8xf32>
    %140 = arith.subf %136, %139 : vector<32x8xf32>
    %141 = math.exp %140 : vector<32x8xf32>
    %cst_57 = arith.constant dense<0.000000e+00> : vector<32xf32>
    %142 = vector.multi_reduction <add>, %141, %cst_57 [1] : vector<32x8xf32> to vector<32xf32>
    %143 = vector.shape_cast %142 : vector<32xf32> to vector<32x1xf32>
    %144 = tpu.reciprocal %143 {approx = true} : vector<32x1xf32> -> vector<32x1xf32>
    %145 = vector.broadcast %144 : vector<32x1xf32> to vector<32x8xf32>
    %146 = arith.mulf %141, %145 : vector<32x8xf32>
    %147 = vector.extract_strided_slice %146 {offsets = [0, 0], sizes = [8, 8], strides = [1, 1]} : vector<32x8xf32> to vector<8x8xf32>
    %148 = vector.extract_strided_slice %111 {offsets = [0, 0], sizes = [8, 8], strides = [1, 1]} : vector<8x32xf32> to vector<8x8xf32>
    %cst_58 = arith.constant dense<0.000000e+00> : vector<8x8xf32>
    %149 = tpu.matmul %147, %148, %cst_58 {dimension_numbers = #tpu.dot_dimension_numbers<[1], [0], [0], [1], [0, 0, 1, 1], [], []>} : vector<8x8xf32>, vector<8x8xf32>, vector<8x8xf32> -> vector<8x8xf32>
    %150 = vector.extract_strided_slice %146 {offsets = [8, 0], sizes = [8, 8], strides = [1, 1]} : vector<32x8xf32> to vector<8x8xf32>
    %151 = vector.extract_strided_slice %111 {offsets = [0, 8], sizes = [8, 8], strides = [1, 1]} : vector<8x32xf32> to vector<8x8xf32>
    %cst_59 = arith.constant dense<0.000000e+00> : vector<8x8xf32>
    %152 = tpu.matmul %150, %151, %cst_59 {dimension_numbers = #tpu.dot_dimension_numbers<[1], [0], [0], [1], [0, 0, 1, 1], [], []>} : vector<8x8xf32>, vector<8x8xf32>, vector<8x8xf32> -> vector<8x8xf32>
    %153 = vector.extract_strided_slice %146 {offsets = [16, 0], sizes = [8, 8], strides = [1, 1]} : vector<32x8xf32> to vector<8x8xf32>
    %154 = vector.extract_strided_slice %111 {offsets = [0, 16], sizes = [8, 8], strides = [1, 1]} : vector<8x32xf32> to vector<8x8xf32>
    %cst_60 = arith.constant dense<0.000000e+00> : vector<8x8xf32>
    %155 = tpu.matmul %153, %154, %cst_60 {dimension_numbers = #tpu.dot_dimension_numbers<[1], [0], [0], [1], [0, 0, 1, 1], [], []>} : vector<8x8xf32>, vector<8x8xf32>, vector<8x8xf32> -> vector<8x8xf32>
    %156 = vector.extract_strided_slice %146 {offsets = [24, 0], sizes = [8, 8], strides = [1, 1]} : vector<32x8xf32> to vector<8x8xf32>
    %157 = vector.extract_strided_slice %111 {offsets = [0, 24], sizes = [8, 8], strides = [1, 1]} : vector<8x32xf32> to vector<8x8xf32>
    %cst_61 = arith.constant dense<0.000000e+00> : vector<8x8xf32>
    %158 = tpu.matmul %156, %157, %cst_61 {dimension_numbers = #tpu.dot_dimension_numbers<[1], [0], [0], [1], [0, 0, 1, 1], [], []>} : vector<8x8xf32>, vector<8x8xf32>, vector<8x8xf32> -> vector<8x8xf32>
    %159 = tpu.concatenate %149, %152, %155, %158 in 1 : vector<8x8xf32>, vector<8x8xf32>, vector<8x8xf32>, vector<8x8xf32> -> vector<8x32xf32>
    %c0_62 = arith.constant 0 : index
    %c0_63 = arith.constant 0 : index
    %c0_64 = arith.constant 0 : index
    %160 = vector.load %arg9[%c0_62, %c0_63, %c0_64] : memref<2x32x32xf32, #tpu.memory_space<vmem>>, vector<1x32x32xf32>
    %161 = vector.shape_cast %160 : vector<1x32x32xf32> to vector<32x32xf32>
    %cst_65 = arith.constant dense<0.000000e+00> : vector<8x32xf32>
    %162 = tpu.matmul %159, %161, %cst_65 {dimension_numbers = #tpu.dot_dimension_numbers<[1], [0], [0], [1], [0, 0, 1, 1], [], []>} : vector<8x32xf32>, vector<32x32xf32>, vector<8x32xf32> -> vector<8x32xf32>
    %163 = vector.extract_strided_slice %9 {offsets = [6, 0], sizes = [1, 32], strides = [1, 1]} : vector<13x128xf32> to vector<1x32xf32>
    %164 = vector.broadcast %163 : vector<1x32xf32> to vector<8x32xf32>
    %165 = arith.addf %162, %164 : vector<8x32xf32>
    %166 = arith.addf %165, %97 : vector<8x32xf32>
    %167 = vector.extract_strided_slice %9 {offsets = [7, 0], sizes = [1, 32], strides = [1, 1]} : vector<13x128xf32> to vector<1x32xf32>
    %168 = vector.extract_strided_slice %9 {offsets = [8, 0], sizes = [1, 32], strides = [1, 1]} : vector<13x128xf32> to vector<1x32xf32>
    %cst_66 = arith.constant dense<0.000000e+00> : vector<8xf32>
    %169 = vector.multi_reduction <add>, %166, %cst_66 [1] : vector<8x32xf32> to vector<8xf32>
    %170 = vector.shape_cast %169 : vector<8xf32> to vector<8x1xf32>
    %cst_67 = arith.constant 3.200000e+01 : f32
    %171 = vector.broadcast %cst_67 : f32 to vector<8x1xf32>
    %172 = arith.divf %170, %171 : vector<8x1xf32>
    %173 = vector.broadcast %172 : vector<8x1xf32> to vector<8x32xf32>
    %174 = arith.subf %166, %173 : vector<8x32xf32>
    %175 = arith.mulf %174, %174 : vector<8x32xf32>
    %cst_68 = arith.constant dense<0.000000e+00> : vector<8xf32>
    %176 = vector.multi_reduction <add>, %175, %cst_68 [1] : vector<8x32xf32> to vector<8xf32>
    %177 = vector.shape_cast %176 : vector<8xf32> to vector<8x1xf32>
    %cst_69 = arith.constant 3.200000e+01 : f32
    %178 = vector.broadcast %cst_69 : f32 to vector<8x1xf32>
    %179 = arith.divf %177, %178 : vector<8x1xf32>
    %180 = vector.broadcast %172 : vector<8x1xf32> to vector<8x32xf32>
    %181 = arith.subf %166, %180 : vector<8x32xf32>
    %cst_70 = arith.constant 9.99999974E-6 : f32
    %182 = vector.broadcast %cst_70 : f32 to vector<8x1xf32>
    %183 = arith.addf %179, %182 : vector<8x1xf32>
    %184 = math.rsqrt %183 : vector<8x1xf32>
    %185 = vector.broadcast %184 : vector<8x1xf32> to vector<8x32xf32>
    %186 = arith.mulf %181, %185 : vector<8x32xf32>
    %187 = vector.broadcast %167 : vector<1x32xf32> to vector<8x32xf32>
    %188 = arith.mulf %186, %187 : vector<8x32xf32>
    %189 = vector.broadcast %168 : vector<1x32xf32> to vector<8x32xf32>
    %190 = arith.addf %188, %189 : vector<8x32xf32>
    %c0_71 = arith.constant 0 : index
    %c0_72 = arith.constant 0 : index
    %c0_73 = arith.constant 0 : index
    %191 = vector.load %arg10[%c0_71, %c0_72, %c0_73] : memref<2x32x64xf32, #tpu.memory_space<vmem>>, vector<1x32x64xf32>
    %192 = vector.shape_cast %191 : vector<1x32x64xf32> to vector<32x64xf32>
    %cst_74 = arith.constant dense<0.000000e+00> : vector<8x64xf32>
    %193 = tpu.matmul %190, %192, %cst_74 {dimension_numbers = #tpu.dot_dimension_numbers<[1], [0], [0], [1], [0, 0, 1, 1], [], []>} : vector<8x32xf32>, vector<32x64xf32>, vector<8x64xf32> -> vector<8x64xf32>
    %194 = vector.extract_strided_slice %9 {offsets = [9, 0], sizes = [1, 64], strides = [1, 1]} : vector<13x128xf32> to vector<1x64xf32>
    %195 = vector.broadcast %194 : vector<1x64xf32> to vector<8x64xf32>
    %196 = arith.addf %193, %195 : vector<8x64xf32>
    %cst_75 = arith.constant 0.000000e+00 : f32
    %197 = vector.broadcast %cst_75 : f32 to vector<8x64xf32>
    %198 = arith.cmpf ogt, %196, %197 : vector<8x64xf32>
    %cst_76 = arith.constant 0.00999999977 : f32
    %199 = vector.broadcast %cst_76 : f32 to vector<8x64xf32>
    %200 = arith.mulf %199, %196 : vector<8x64xf32>
    %201 = arith.select %198, %196, %200 : vector<8x64xi1>, vector<8x64xf32>
    %c0_77 = arith.constant 0 : index
    %c0_78 = arith.constant 0 : index
    %c0_79 = arith.constant 0 : index
    %202 = vector.load %arg11[%c0_77, %c0_78, %c0_79] : memref<2x64x32xf32, #tpu.memory_space<vmem>>, vector<1x64x32xf32>
    %203 = vector.shape_cast %202 : vector<1x64x32xf32> to vector<64x32xf32>
    %cst_80 = arith.constant dense<0.000000e+00> : vector<8x32xf32>
    %204 = tpu.matmul %201, %203, %cst_80 {dimension_numbers = #tpu.dot_dimension_numbers<[1], [0], [0], [1], [0, 0, 1, 1], [], []>} : vector<8x64xf32>, vector<64x32xf32>, vector<8x32xf32> -> vector<8x32xf32>
    %205 = vector.extract_strided_slice %9 {offsets = [10, 0], sizes = [1, 32], strides = [1, 1]} : vector<13x128xf32> to vector<1x32xf32>
    %206 = vector.broadcast %205 : vector<1x32xf32> to vector<8x32xf32>
    %207 = arith.addf %204, %206 : vector<8x32xf32>
    %208 = arith.addf %207, %190 : vector<8x32xf32>
    %209 = vector.extract_strided_slice %9 {offsets = [11, 0], sizes = [1, 32], strides = [1, 1]} : vector<13x128xf32> to vector<1x32xf32>
    %210 = vector.extract_strided_slice %9 {offsets = [12, 0], sizes = [1, 32], strides = [1, 1]} : vector<13x128xf32> to vector<1x32xf32>
    %cst_81 = arith.constant dense<0.000000e+00> : vector<8xf32>
    %211 = vector.multi_reduction <add>, %208, %cst_81 [1] : vector<8x32xf32> to vector<8xf32>
    %212 = vector.shape_cast %211 : vector<8xf32> to vector<8x1xf32>
    %cst_82 = arith.constant 3.200000e+01 : f32
    %213 = vector.broadcast %cst_82 : f32 to vector<8x1xf32>
    %214 = arith.divf %212, %213 : vector<8x1xf32>
    %215 = vector.broadcast %214 : vector<8x1xf32> to vector<8x32xf32>
    %216 = arith.subf %208, %215 : vector<8x32xf32>
    %217 = arith.mulf %216, %216 : vector<8x32xf32>
    %cst_83 = arith.constant dense<0.000000e+00> : vector<8xf32>
    %218 = vector.multi_reduction <add>, %217, %cst_83 [1] : vector<8x32xf32> to vector<8xf32>
    %219 = vector.shape_cast %218 : vector<8xf32> to vector<8x1xf32>
    %cst_84 = arith.constant 3.200000e+01 : f32
    %220 = vector.broadcast %cst_84 : f32 to vector<8x1xf32>
    %221 = arith.divf %219, %220 : vector<8x1xf32>
    %222 = vector.broadcast %214 : vector<8x1xf32> to vector<8x32xf32>
    %223 = arith.subf %208, %222 : vector<8x32xf32>
    %cst_85 = arith.constant 9.99999974E-6 : f32
    %224 = vector.broadcast %cst_85 : f32 to vector<8x1xf32>
    %225 = arith.addf %221, %224 : vector<8x1xf32>
    %226 = math.rsqrt %225 : vector<8x1xf32>
    %227 = vector.broadcast %226 : vector<8x1xf32> to vector<8x32xf32>
    %228 = arith.mulf %223, %227 : vector<8x32xf32>
    %229 = vector.broadcast %209 : vector<1x32xf32> to vector<8x32xf32>
    %230 = arith.mulf %228, %229 : vector<8x32xf32>
    %231 = vector.broadcast %210 : vector<1x32xf32> to vector<8x32xf32>
    %232 = arith.addf %230, %231 : vector<8x32xf32>
    %c1 = arith.constant 1 : index
    %c0_86 = arith.constant 0 : index
    %c0_87 = arith.constant 0 : index
    %233 = vector.load %arg12[%c1, %c0_86, %c0_87] : memref<2x13x128xf32, #tpu.memory_space<vmem>>, vector<1x13x128xf32>
    %234 = vector.shape_cast %233 : vector<1x13x128xf32> to vector<13x128xf32>
    %c1_88 = arith.constant 1 : index
    %c0_89 = arith.constant 0 : index
    %c0_90 = arith.constant 0 : index
    %235 = vector.load %arg5[%c1_88, %c0_89, %c0_90] : memref<2x32x96xf32, #tpu.memory_space<vmem>>, vector<1x32x96xf32>
    %236 = vector.shape_cast %235 : vector<1x32x96xf32> to vector<32x96xf32>
    %cst_91 = arith.constant dense<0.000000e+00> : vector<8x96xf32>
    %237 = tpu.matmul %232, %236, %cst_91 {dimension_numbers = #tpu.dot_dimension_numbers<[1], [0], [0], [1], [0, 0, 1, 1], [], []>} : vector<8x32xf32>, vector<32x96xf32>, vector<8x96xf32> -> vector<8x96xf32>
    %238 = vector.extract_strided_slice %234 {offsets = [0, 0], sizes = [1, 96], strides = [1, 1]} : vector<13x128xf32> to vector<1x96xf32>
    %239 = vector.broadcast %238 : vector<1x96xf32> to vector<8x96xf32>
    %240 = arith.addf %237, %239 : vector<8x96xf32>
    %241 = vector.extract_strided_slice %240 {offsets = [0, 0], sizes = [8, 32], strides = [1, 1]} : vector<8x96xf32> to vector<8x32xf32>
    %242 = vector.extract_strided_slice %240 {offsets = [0, 32], sizes = [8, 32], strides = [1, 1]} : vector<8x96xf32> to vector<8x32xf32>
    %243 = vector.extract_strided_slice %240 {offsets = [0, 64], sizes = [8, 32], strides = [1, 1]} : vector<8x96xf32> to vector<8x32xf32>
    %244 = vector.extract_strided_slice %241 {offsets = [0, 0], sizes = [8, 8], strides = [1, 1]} : vector<8x32xf32> to vector<8x8xf32>
    %245 = vector.extract_strided_slice %242 {offsets = [0, 0], sizes = [8, 8], strides = [1, 1]} : vector<8x32xf32> to vector<8x8xf32>
    %cst_92 = arith.constant dense<0.000000e+00> : vector<8x8xf32>
    %246 = tpu.matmul %244, %245, %cst_92 {dimension_numbers = #tpu.dot_dimension_numbers<[1], [1], [0], [0], [0, 0, 1, 0], [], []>} : vector<8x8xf32>, vector<8x8xf32>, vector<8x8xf32> -> vector<8x8xf32>
    %cst_93 = arith.constant 0.353553385 : f32
    %247 = vector.broadcast %cst_93 : f32 to vector<8x8xf32>
    %248 = arith.mulf %246, %247 : vector<8x8xf32>
    %249 = arith.addf %248, %5 : vector<8x8xf32>
    %250 = vector.extract_strided_slice %241 {offsets = [0, 8], sizes = [8, 8], strides = [1, 1]} : vector<8x32xf32> to vector<8x8xf32>
    %251 = vector.extract_strided_slice %242 {offsets = [0, 8], sizes = [8, 8], strides = [1, 1]} : vector<8x32xf32> to vector<8x8xf32>
    %cst_94 = arith.constant dense<0.000000e+00> : vector<8x8xf32>
    %252 = tpu.matmul %250, %251, %cst_94 {dimension_numbers = #tpu.dot_dimension_numbers<[1], [1], [0], [0], [0, 0, 1, 0], [], []>} : vector<8x8xf32>, vector<8x8xf32>, vector<8x8xf32> -> vector<8x8xf32>
    %cst_95 = arith.constant 0.353553385 : f32
    %253 = vector.broadcast %cst_95 : f32 to vector<8x8xf32>
    %254 = arith.mulf %252, %253 : vector<8x8xf32>
    %255 = arith.addf %254, %5 : vector<8x8xf32>
    %256 = vector.extract_strided_slice %241 {offsets = [0, 16], sizes = [8, 8], strides = [1, 1]} : vector<8x32xf32> to vector<8x8xf32>
    %257 = vector.extract_strided_slice %242 {offsets = [0, 16], sizes = [8, 8], strides = [1, 1]} : vector<8x32xf32> to vector<8x8xf32>
    %cst_96 = arith.constant dense<0.000000e+00> : vector<8x8xf32>
    %258 = tpu.matmul %256, %257, %cst_96 {dimension_numbers = #tpu.dot_dimension_numbers<[1], [1], [0], [0], [0, 0, 1, 0], [], []>} : vector<8x8xf32>, vector<8x8xf32>, vector<8x8xf32> -> vector<8x8xf32>
    %cst_97 = arith.constant 0.353553385 : f32
    %259 = vector.broadcast %cst_97 : f32 to vector<8x8xf32>
    %260 = arith.mulf %258, %259 : vector<8x8xf32>
    %261 = arith.addf %260, %5 : vector<8x8xf32>
    %262 = vector.extract_strided_slice %241 {offsets = [0, 24], sizes = [8, 8], strides = [1, 1]} : vector<8x32xf32> to vector<8x8xf32>
    %263 = vector.extract_strided_slice %242 {offsets = [0, 24], sizes = [8, 8], strides = [1, 1]} : vector<8x32xf32> to vector<8x8xf32>
    %cst_98 = arith.constant dense<0.000000e+00> : vector<8x8xf32>
    %264 = tpu.matmul %262, %263, %cst_98 {dimension_numbers = #tpu.dot_dimension_numbers<[1], [1], [0], [0], [0, 0, 1, 0], [], []>} : vector<8x8xf32>, vector<8x8xf32>, vector<8x8xf32> -> vector<8x8xf32>
    %cst_99 = arith.constant 0.353553385 : f32
    %265 = vector.broadcast %cst_99 : f32 to vector<8x8xf32>
    %266 = arith.mulf %264, %265 : vector<8x8xf32>
    %267 = arith.addf %266, %5 : vector<8x8xf32>
    %268 = tpu.concatenate %249, %255, %261, %267 in 0 : vector<8x8xf32>, vector<8x8xf32>, vector<8x8xf32>, vector<8x8xf32> -> vector<32x8xf32>
    %cst_100 = arith.constant dense<0xFF800000> : vector<32xf32>
    %269 = vector.multi_reduction <maximumf>, %268, %cst_100 [1] : vector<32x8xf32> to vector<32xf32>
    %270 = vector.shape_cast %269 : vector<32xf32> to vector<32x1xf32>
    %271 = vector.broadcast %270 : vector<32x1xf32> to vector<32x8xf32>
    %272 = arith.subf %268, %271 : vector<32x8xf32>
    %273 = math.exp %272 : vector<32x8xf32>
    %cst_101 = arith.constant dense<0.000000e+00> : vector<32xf32>
    %274 = vector.multi_reduction <add>, %273, %cst_101 [1] : vector<32x8xf32> to vector<32xf32>
    %275 = vector.shape_cast %274 : vector<32xf32> to vector<32x1xf32>
    %276 = tpu.reciprocal %275 {approx = true} : vector<32x1xf32> -> vector<32x1xf32>
    %277 = vector.broadcast %276 : vector<32x1xf32> to vector<32x8xf32>
    %278 = arith.mulf %273, %277 : vector<32x8xf32>
    %279 = vector.extract_strided_slice %278 {offsets = [0, 0], sizes = [8, 8], strides = [1, 1]} : vector<32x8xf32> to vector<8x8xf32>
    %280 = vector.extract_strided_slice %243 {offsets = [0, 0], sizes = [8, 8], strides = [1, 1]} : vector<8x32xf32> to vector<8x8xf32>
    %cst_102 = arith.constant dense<0.000000e+00> : vector<8x8xf32>
    %281 = tpu.matmul %279, %280, %cst_102 {dimension_numbers = #tpu.dot_dimension_numbers<[1], [0], [0], [1], [0, 0, 1, 1], [], []>} : vector<8x8xf32>, vector<8x8xf32>, vector<8x8xf32> -> vector<8x8xf32>
    %282 = vector.extract_strided_slice %278 {offsets = [8, 0], sizes = [8, 8], strides = [1, 1]} : vector<32x8xf32> to vector<8x8xf32>
    %283 = vector.extract_strided_slice %243 {offsets = [0, 8], sizes = [8, 8], strides = [1, 1]} : vector<8x32xf32> to vector<8x8xf32>
    %cst_103 = arith.constant dense<0.000000e+00> : vector<8x8xf32>
    %284 = tpu.matmul %282, %283, %cst_103 {dimension_numbers = #tpu.dot_dimension_numbers<[1], [0], [0], [1], [0, 0, 1, 1], [], []>} : vector<8x8xf32>, vector<8x8xf32>, vector<8x8xf32> -> vector<8x8xf32>
    %285 = vector.extract_strided_slice %278 {offsets = [16, 0], sizes = [8, 8], strides = [1, 1]} : vector<32x8xf32> to vector<8x8xf32>
    %286 = vector.extract_strided_slice %243 {offsets = [0, 16], sizes = [8, 8], strides = [1, 1]} : vector<8x32xf32> to vector<8x8xf32>
    %cst_104 = arith.constant dense<0.000000e+00> : vector<8x8xf32>
    %287 = tpu.matmul %285, %286, %cst_104 {dimension_numbers = #tpu.dot_dimension_numbers<[1], [0], [0], [1], [0, 0, 1, 1], [], []>} : vector<8x8xf32>, vector<8x8xf32>, vector<8x8xf32> -> vector<8x8xf32>
    %288 = vector.extract_strided_slice %278 {offsets = [24, 0], sizes = [8, 8], strides = [1, 1]} : vector<32x8xf32> to vector<8x8xf32>
    %289 = vector.extract_strided_slice %243 {offsets = [0, 24], sizes = [8, 8], strides = [1, 1]} : vector<8x32xf32> to vector<8x8xf32>
    %cst_105 = arith.constant dense<0.000000e+00> : vector<8x8xf32>
    %290 = tpu.matmul %288, %289, %cst_105 {dimension_numbers = #tpu.dot_dimension_numbers<[1], [0], [0], [1], [0, 0, 1, 1], [], []>} : vector<8x8xf32>, vector<8x8xf32>, vector<8x8xf32> -> vector<8x8xf32>
    %291 = tpu.concatenate %281, %284, %287, %290 in 1 : vector<8x8xf32>, vector<8x8xf32>, vector<8x8xf32>, vector<8x8xf32> -> vector<8x32xf32>
    %c1_106 = arith.constant 1 : index
    %c0_107 = arith.constant 0 : index
    %c0_108 = arith.constant 0 : index
    %292 = vector.load %arg6[%c1_106, %c0_107, %c0_108] : memref<2x32x32xf32, #tpu.memory_space<vmem>>, vector<1x32x32xf32>
    %293 = vector.shape_cast %292 : vector<1x32x32xf32> to vector<32x32xf32>
    %cst_109 = arith.constant dense<0.000000e+00> : vector<8x32xf32>
    %294 = tpu.matmul %291, %293, %cst_109 {dimension_numbers = #tpu.dot_dimension_numbers<[1], [0], [0], [1], [0, 0, 1, 1], [], []>} : vector<8x32xf32>, vector<32x32xf32>, vector<8x32xf32> -> vector<8x32xf32>
    %295 = vector.extract_strided_slice %234 {offsets = [1, 0], sizes = [1, 32], strides = [1, 1]} : vector<13x128xf32> to vector<1x32xf32>
    %296 = vector.broadcast %295 : vector<1x32xf32> to vector<8x32xf32>
    %297 = arith.addf %294, %296 : vector<8x32xf32>
    %298 = arith.addf %297, %232 : vector<8x32xf32>
    %299 = vector.extract_strided_slice %234 {offsets = [2, 0], sizes = [1, 32], strides = [1, 1]} : vector<13x128xf32> to vector<1x32xf32>
    %300 = vector.extract_strided_slice %234 {offsets = [3, 0], sizes = [1, 32], strides = [1, 1]} : vector<13x128xf32> to vector<1x32xf32>
    %cst_110 = arith.constant dense<0.000000e+00> : vector<8xf32>
    %301 = vector.multi_reduction <add>, %298, %cst_110 [1] : vector<8x32xf32> to vector<8xf32>
    %302 = vector.shape_cast %301 : vector<8xf32> to vector<8x1xf32>
    %cst_111 = arith.constant 3.200000e+01 : f32
    %303 = vector.broadcast %cst_111 : f32 to vector<8x1xf32>
    %304 = arith.divf %302, %303 : vector<8x1xf32>
    %305 = vector.broadcast %304 : vector<8x1xf32> to vector<8x32xf32>
    %306 = arith.subf %298, %305 : vector<8x32xf32>
    %307 = arith.mulf %306, %306 : vector<8x32xf32>
    %cst_112 = arith.constant dense<0.000000e+00> : vector<8xf32>
    %308 = vector.multi_reduction <add>, %307, %cst_112 [1] : vector<8x32xf32> to vector<8xf32>
    %309 = vector.shape_cast %308 : vector<8xf32> to vector<8x1xf32>
    %cst_113 = arith.constant 3.200000e+01 : f32
    %310 = vector.broadcast %cst_113 : f32 to vector<8x1xf32>
    %311 = arith.divf %309, %310 : vector<8x1xf32>
    %312 = vector.broadcast %304 : vector<8x1xf32> to vector<8x32xf32>
    %313 = arith.subf %298, %312 : vector<8x32xf32>
    %cst_114 = arith.constant 9.99999974E-6 : f32
    %314 = vector.broadcast %cst_114 : f32 to vector<8x1xf32>
    %315 = arith.addf %311, %314 : vector<8x1xf32>
    %316 = math.rsqrt %315 : vector<8x1xf32>
    %317 = vector.broadcast %316 : vector<8x1xf32> to vector<8x32xf32>
    %318 = arith.mulf %313, %317 : vector<8x32xf32>
    %319 = vector.broadcast %299 : vector<1x32xf32> to vector<8x32xf32>
    %320 = arith.mulf %318, %319 : vector<8x32xf32>
    %321 = vector.broadcast %300 : vector<1x32xf32> to vector<8x32xf32>
    %322 = arith.addf %320, %321 : vector<8x32xf32>
    %c1_115 = arith.constant 1 : index
    %c0_116 = arith.constant 0 : index
    %c0_117 = arith.constant 0 : index
    %323 = vector.load %arg7[%c1_115, %c0_116, %c0_117] : memref<2x32x32xf32, #tpu.memory_space<vmem>>, vector<1x32x32xf32>
    %324 = vector.shape_cast %323 : vector<1x32x32xf32> to vector<32x32xf32>
    %cst_118 = arith.constant dense<0.000000e+00> : vector<8x32xf32>
    %325 = tpu.matmul %322, %324, %cst_118 {dimension_numbers = #tpu.dot_dimension_numbers<[1], [0], [0], [1], [0, 0, 1, 1], [], []>} : vector<8x32xf32>, vector<32x32xf32>, vector<8x32xf32> -> vector<8x32xf32>
    %326 = vector.extract_strided_slice %234 {offsets = [4, 0], sizes = [1, 32], strides = [1, 1]} : vector<13x128xf32> to vector<1x32xf32>
    %327 = vector.broadcast %326 : vector<1x32xf32> to vector<8x32xf32>
    %328 = arith.addf %325, %327 : vector<8x32xf32>
    %c1_119 = arith.constant 1 : index
    %c0_120 = arith.constant 0 : index
    %c0_121 = arith.constant 0 : index
    %329 = vector.load %arg8[%c1_119, %c0_120, %c0_121] : memref<2x32x64xf32, #tpu.memory_space<vmem>>, vector<1x32x64xf32>
    %330 = vector.shape_cast %329 : vector<1x32x64xf32> to vector<32x64xf32>
    %cst_122 = arith.constant dense<0.000000e+00> : vector<8x64xf32>
    %331 = tpu.matmul %3, %330, %cst_122 {dimension_numbers = #tpu.dot_dimension_numbers<[1], [0], [0], [1], [0, 0, 1, 1], [], []>} : vector<8x32xf32>, vector<32x64xf32>, vector<8x64xf32> -> vector<8x64xf32>
    %332 = vector.extract_strided_slice %234 {offsets = [5, 0], sizes = [1, 64], strides = [1, 1]} : vector<13x128xf32> to vector<1x64xf32>
    %333 = vector.broadcast %332 : vector<1x64xf32> to vector<8x64xf32>
    %334 = arith.addf %331, %333 : vector<8x64xf32>
    %335 = vector.extract_strided_slice %334 {offsets = [0, 0], sizes = [8, 32], strides = [1, 1]} : vector<8x64xf32> to vector<8x32xf32>
    %336 = vector.extract_strided_slice %334 {offsets = [0, 32], sizes = [8, 32], strides = [1, 1]} : vector<8x64xf32> to vector<8x32xf32>
    %337 = vector.extract_strided_slice %328 {offsets = [0, 0], sizes = [8, 8], strides = [1, 1]} : vector<8x32xf32> to vector<8x8xf32>
    %338 = vector.extract_strided_slice %335 {offsets = [0, 0], sizes = [8, 8], strides = [1, 1]} : vector<8x32xf32> to vector<8x8xf32>
    %cst_123 = arith.constant dense<0.000000e+00> : vector<8x8xf32>
    %339 = tpu.matmul %337, %338, %cst_123 {dimension_numbers = #tpu.dot_dimension_numbers<[1], [1], [0], [0], [0, 0, 1, 0], [], []>} : vector<8x8xf32>, vector<8x8xf32>, vector<8x8xf32> -> vector<8x8xf32>
    %cst_124 = arith.constant 0.353553385 : f32
    %340 = vector.broadcast %cst_124 : f32 to vector<8x8xf32>
    %341 = arith.mulf %339, %340 : vector<8x8xf32>
    %342 = arith.addf %341, %7 : vector<8x8xf32>
    %343 = vector.extract_strided_slice %328 {offsets = [0, 8], sizes = [8, 8], strides = [1, 1]} : vector<8x32xf32> to vector<8x8xf32>
    %344 = vector.extract_strided_slice %335 {offsets = [0, 8], sizes = [8, 8], strides = [1, 1]} : vector<8x32xf32> to vector<8x8xf32>
    %cst_125 = arith.constant dense<0.000000e+00> : vector<8x8xf32>
    %345 = tpu.matmul %343, %344, %cst_125 {dimension_numbers = #tpu.dot_dimension_numbers<[1], [1], [0], [0], [0, 0, 1, 0], [], []>} : vector<8x8xf32>, vector<8x8xf32>, vector<8x8xf32> -> vector<8x8xf32>
    %cst_126 = arith.constant 0.353553385 : f32
    %346 = vector.broadcast %cst_126 : f32 to vector<8x8xf32>
    %347 = arith.mulf %345, %346 : vector<8x8xf32>
    %348 = arith.addf %347, %7 : vector<8x8xf32>
    %349 = vector.extract_strided_slice %328 {offsets = [0, 16], sizes = [8, 8], strides = [1, 1]} : vector<8x32xf32> to vector<8x8xf32>
    %350 = vector.extract_strided_slice %335 {offsets = [0, 16], sizes = [8, 8], strides = [1, 1]} : vector<8x32xf32> to vector<8x8xf32>
    %cst_127 = arith.constant dense<0.000000e+00> : vector<8x8xf32>
    %351 = tpu.matmul %349, %350, %cst_127 {dimension_numbers = #tpu.dot_dimension_numbers<[1], [1], [0], [0], [0, 0, 1, 0], [], []>} : vector<8x8xf32>, vector<8x8xf32>, vector<8x8xf32> -> vector<8x8xf32>
    %cst_128 = arith.constant 0.353553385 : f32
    %352 = vector.broadcast %cst_128 : f32 to vector<8x8xf32>
    %353 = arith.mulf %351, %352 : vector<8x8xf32>
    %354 = arith.addf %353, %7 : vector<8x8xf32>
    %355 = vector.extract_strided_slice %328 {offsets = [0, 24], sizes = [8, 8], strides = [1, 1]} : vector<8x32xf32> to vector<8x8xf32>
    %356 = vector.extract_strided_slice %335 {offsets = [0, 24], sizes = [8, 8], strides = [1, 1]} : vector<8x32xf32> to vector<8x8xf32>
    %cst_129 = arith.constant dense<0.000000e+00> : vector<8x8xf32>
    %357 = tpu.matmul %355, %356, %cst_129 {dimension_numbers = #tpu.dot_dimension_numbers<[1], [1], [0], [0], [0, 0, 1, 0], [], []>} : vector<8x8xf32>, vector<8x8xf32>, vector<8x8xf32> -> vector<8x8xf32>
    %cst_130 = arith.constant 0.353553385 : f32
    %358 = vector.broadcast %cst_130 : f32 to vector<8x8xf32>
    %359 = arith.mulf %357, %358 : vector<8x8xf32>
    %360 = arith.addf %359, %7 : vector<8x8xf32>
    %361 = tpu.concatenate %342, %348, %354, %360 in 0 : vector<8x8xf32>, vector<8x8xf32>, vector<8x8xf32>, vector<8x8xf32> -> vector<32x8xf32>
    %cst_131 = arith.constant dense<0xFF800000> : vector<32xf32>
    %362 = vector.multi_reduction <maximumf>, %361, %cst_131 [1] : vector<32x8xf32> to vector<32xf32>
    %363 = vector.shape_cast %362 : vector<32xf32> to vector<32x1xf32>
    %364 = vector.broadcast %363 : vector<32x1xf32> to vector<32x8xf32>
    %365 = arith.subf %361, %364 : vector<32x8xf32>
    %366 = math.exp %365 : vector<32x8xf32>
    %cst_132 = arith.constant dense<0.000000e+00> : vector<32xf32>
    %367 = vector.multi_reduction <add>, %366, %cst_132 [1] : vector<32x8xf32> to vector<32xf32>
    %368 = vector.shape_cast %367 : vector<32xf32> to vector<32x1xf32>
    %369 = tpu.reciprocal %368 {approx = true} : vector<32x1xf32> -> vector<32x1xf32>
    %370 = vector.broadcast %369 : vector<32x1xf32> to vector<32x8xf32>
    %371 = arith.mulf %366, %370 : vector<32x8xf32>
    %372 = vector.extract_strided_slice %371 {offsets = [0, 0], sizes = [8, 8], strides = [1, 1]} : vector<32x8xf32> to vector<8x8xf32>
    %373 = vector.extract_strided_slice %336 {offsets = [0, 0], sizes = [8, 8], strides = [1, 1]} : vector<8x32xf32> to vector<8x8xf32>
    %cst_133 = arith.constant dense<0.000000e+00> : vector<8x8xf32>
    %374 = tpu.matmul %372, %373, %cst_133 {dimension_numbers = #tpu.dot_dimension_numbers<[1], [0], [0], [1], [0, 0, 1, 1], [], []>} : vector<8x8xf32>, vector<8x8xf32>, vector<8x8xf32> -> vector<8x8xf32>
    %375 = vector.extract_strided_slice %371 {offsets = [8, 0], sizes = [8, 8], strides = [1, 1]} : vector<32x8xf32> to vector<8x8xf32>
    %376 = vector.extract_strided_slice %336 {offsets = [0, 8], sizes = [8, 8], strides = [1, 1]} : vector<8x32xf32> to vector<8x8xf32>
    %cst_134 = arith.constant dense<0.000000e+00> : vector<8x8xf32>
    %377 = tpu.matmul %375, %376, %cst_134 {dimension_numbers = #tpu.dot_dimension_numbers<[1], [0], [0], [1], [0, 0, 1, 1], [], []>} : vector<8x8xf32>, vector<8x8xf32>, vector<8x8xf32> -> vector<8x8xf32>
    %378 = vector.extract_strided_slice %371 {offsets = [16, 0], sizes = [8, 8], strides = [1, 1]} : vector<32x8xf32> to vector<8x8xf32>
    %379 = vector.extract_strided_slice %336 {offsets = [0, 16], sizes = [8, 8], strides = [1, 1]} : vector<8x32xf32> to vector<8x8xf32>
    %cst_135 = arith.constant dense<0.000000e+00> : vector<8x8xf32>
    %380 = tpu.matmul %378, %379, %cst_135 {dimension_numbers = #tpu.dot_dimension_numbers<[1], [0], [0], [1], [0, 0, 1, 1], [], []>} : vector<8x8xf32>, vector<8x8xf32>, vector<8x8xf32> -> vector<8x8xf32>
    %381 = vector.extract_strided_slice %371 {offsets = [24, 0], sizes = [8, 8], strides = [1, 1]} : vector<32x8xf32> to vector<8x8xf32>
    %382 = vector.extract_strided_slice %336 {offsets = [0, 24], sizes = [8, 8], strides = [1, 1]} : vector<8x32xf32> to vector<8x8xf32>
    %cst_136 = arith.constant dense<0.000000e+00> : vector<8x8xf32>
    %383 = tpu.matmul %381, %382, %cst_136 {dimension_numbers = #tpu.dot_dimension_numbers<[1], [0], [0], [1], [0, 0, 1, 1], [], []>} : vector<8x8xf32>, vector<8x8xf32>, vector<8x8xf32> -> vector<8x8xf32>
    %384 = tpu.concatenate %374, %377, %380, %383 in 1 : vector<8x8xf32>, vector<8x8xf32>, vector<8x8xf32>, vector<8x8xf32> -> vector<8x32xf32>
    %c1_137 = arith.constant 1 : index
    %c0_138 = arith.constant 0 : index
    %c0_139 = arith.constant 0 : index
    %385 = vector.load %arg9[%c1_137, %c0_138, %c0_139] : memref<2x32x32xf32, #tpu.memory_space<vmem>>, vector<1x32x32xf32>
    %386 = vector.shape_cast %385 : vector<1x32x32xf32> to vector<32x32xf32>
    %cst_140 = arith.constant dense<0.000000e+00> : vector<8x32xf32>
    %387 = tpu.matmul %384, %386, %cst_140 {dimension_numbers = #tpu.dot_dimension_numbers<[1], [0], [0], [1], [0, 0, 1, 1], [], []>} : vector<8x32xf32>, vector<32x32xf32>, vector<8x32xf32> -> vector<8x32xf32>
    %388 = vector.extract_strided_slice %234 {offsets = [6, 0], sizes = [1, 32], strides = [1, 1]} : vector<13x128xf32> to vector<1x32xf32>
    %389 = vector.broadcast %388 : vector<1x32xf32> to vector<8x32xf32>
    %390 = arith.addf %387, %389 : vector<8x32xf32>
    %391 = arith.addf %390, %322 : vector<8x32xf32>
    %392 = vector.extract_strided_slice %234 {offsets = [7, 0], sizes = [1, 32], strides = [1, 1]} : vector<13x128xf32> to vector<1x32xf32>
    %393 = vector.extract_strided_slice %234 {offsets = [8, 0], sizes = [1, 32], strides = [1, 1]} : vector<13x128xf32> to vector<1x32xf32>
    %cst_141 = arith.constant dense<0.000000e+00> : vector<8xf32>
    %394 = vector.multi_reduction <add>, %391, %cst_141 [1] : vector<8x32xf32> to vector<8xf32>
    %395 = vector.shape_cast %394 : vector<8xf32> to vector<8x1xf32>
    %cst_142 = arith.constant 3.200000e+01 : f32
    %396 = vector.broadcast %cst_142 : f32 to vector<8x1xf32>
    %397 = arith.divf %395, %396 : vector<8x1xf32>
    %398 = vector.broadcast %397 : vector<8x1xf32> to vector<8x32xf32>
    %399 = arith.subf %391, %398 : vector<8x32xf32>
    %400 = arith.mulf %399, %399 : vector<8x32xf32>
    %cst_143 = arith.constant dense<0.000000e+00> : vector<8xf32>
    %401 = vector.multi_reduction <add>, %400, %cst_143 [1] : vector<8x32xf32> to vector<8xf32>
    %402 = vector.shape_cast %401 : vector<8xf32> to vector<8x1xf32>
    %cst_144 = arith.constant 3.200000e+01 : f32
    %403 = vector.broadcast %cst_144 : f32 to vector<8x1xf32>
    %404 = arith.divf %402, %403 : vector<8x1xf32>
    %405 = vector.broadcast %397 : vector<8x1xf32> to vector<8x32xf32>
    %406 = arith.subf %391, %405 : vector<8x32xf32>
    %cst_145 = arith.constant 9.99999974E-6 : f32
    %407 = vector.broadcast %cst_145 : f32 to vector<8x1xf32>
    %408 = arith.addf %404, %407 : vector<8x1xf32>
    %409 = math.rsqrt %408 : vector<8x1xf32>
    %410 = vector.broadcast %409 : vector<8x1xf32> to vector<8x32xf32>
    %411 = arith.mulf %406, %410 : vector<8x32xf32>
    %412 = vector.broadcast %392 : vector<1x32xf32> to vector<8x32xf32>
    %413 = arith.mulf %411, %412 : vector<8x32xf32>
    %414 = vector.broadcast %393 : vector<1x32xf32> to vector<8x32xf32>
    %415 = arith.addf %413, %414 : vector<8x32xf32>
    %c1_146 = arith.constant 1 : index
    %c0_147 = arith.constant 0 : index
    %c0_148 = arith.constant 0 : index
    %416 = vector.load %arg10[%c1_146, %c0_147, %c0_148] : memref<2x32x64xf32, #tpu.memory_space<vmem>>, vector<1x32x64xf32>
    %417 = vector.shape_cast %416 : vector<1x32x64xf32> to vector<32x64xf32>
    %cst_149 = arith.constant dense<0.000000e+00> : vector<8x64xf32>
    %418 = tpu.matmul %415, %417, %cst_149 {dimension_numbers = #tpu.dot_dimension_numbers<[1], [0], [0], [1], [0, 0, 1, 1], [], []>} : vector<8x32xf32>, vector<32x64xf32>, vector<8x64xf32> -> vector<8x64xf32>
    %419 = vector.extract_strided_slice %234 {offsets = [9, 0], sizes = [1, 64], strides = [1, 1]} : vector<13x128xf32> to vector<1x64xf32>
    %420 = vector.broadcast %419 : vector<1x64xf32> to vector<8x64xf32>
    %421 = arith.addf %418, %420 : vector<8x64xf32>
    %cst_150 = arith.constant 0.000000e+00 : f32
    %422 = vector.broadcast %cst_150 : f32 to vector<8x64xf32>
    %423 = arith.cmpf ogt, %421, %422 : vector<8x64xf32>
    %cst_151 = arith.constant 0.00999999977 : f32
    %424 = vector.broadcast %cst_151 : f32 to vector<8x64xf32>
    %425 = arith.mulf %424, %421 : vector<8x64xf32>
    %426 = arith.select %423, %421, %425 : vector<8x64xi1>, vector<8x64xf32>
    %c1_152 = arith.constant 1 : index
    %c0_153 = arith.constant 0 : index
    %c0_154 = arith.constant 0 : index
    %427 = vector.load %arg11[%c1_152, %c0_153, %c0_154] : memref<2x64x32xf32, #tpu.memory_space<vmem>>, vector<1x64x32xf32>
    %428 = vector.shape_cast %427 : vector<1x64x32xf32> to vector<64x32xf32>
    %cst_155 = arith.constant dense<0.000000e+00> : vector<8x32xf32>
    %429 = tpu.matmul %426, %428, %cst_155 {dimension_numbers = #tpu.dot_dimension_numbers<[1], [0], [0], [1], [0, 0, 1, 1], [], []>} : vector<8x64xf32>, vector<64x32xf32>, vector<8x32xf32> -> vector<8x32xf32>
    %430 = vector.extract_strided_slice %234 {offsets = [10, 0], sizes = [1, 32], strides = [1, 1]} : vector<13x128xf32> to vector<1x32xf32>
    %431 = vector.broadcast %430 : vector<1x32xf32> to vector<8x32xf32>
    %432 = arith.addf %429, %431 : vector<8x32xf32>
    %433 = arith.addf %432, %415 : vector<8x32xf32>
    %434 = vector.extract_strided_slice %234 {offsets = [11, 0], sizes = [1, 32], strides = [1, 1]} : vector<13x128xf32> to vector<1x32xf32>
    %435 = vector.extract_strided_slice %234 {offsets = [12, 0], sizes = [1, 32], strides = [1, 1]} : vector<13x128xf32> to vector<1x32xf32>
    %cst_156 = arith.constant dense<0.000000e+00> : vector<8xf32>
    %436 = vector.multi_reduction <add>, %433, %cst_156 [1] : vector<8x32xf32> to vector<8xf32>
    %437 = vector.shape_cast %436 : vector<8xf32> to vector<8x1xf32>
    %cst_157 = arith.constant 3.200000e+01 : f32
    %438 = vector.broadcast %cst_157 : f32 to vector<8x1xf32>
    %439 = arith.divf %437, %438 : vector<8x1xf32>
    %440 = vector.broadcast %439 : vector<8x1xf32> to vector<8x32xf32>
    %441 = arith.subf %433, %440 : vector<8x32xf32>
    %442 = arith.mulf %441, %441 : vector<8x32xf32>
    %cst_158 = arith.constant dense<0.000000e+00> : vector<8xf32>
    %443 = vector.multi_reduction <add>, %442, %cst_158 [1] : vector<8x32xf32> to vector<8xf32>
    %444 = vector.shape_cast %443 : vector<8xf32> to vector<8x1xf32>
    %cst_159 = arith.constant 3.200000e+01 : f32
    %445 = vector.broadcast %cst_159 : f32 to vector<8x1xf32>
    %446 = arith.divf %444, %445 : vector<8x1xf32>
    %447 = vector.broadcast %439 : vector<8x1xf32> to vector<8x32xf32>
    %448 = arith.subf %433, %447 : vector<8x32xf32>
    %cst_160 = arith.constant 9.99999974E-6 : f32
    %449 = vector.broadcast %cst_160 : f32 to vector<8x1xf32>
    %450 = arith.addf %446, %449 : vector<8x1xf32>
    %451 = math.rsqrt %450 : vector<8x1xf32>
    %452 = vector.broadcast %451 : vector<8x1xf32> to vector<8x32xf32>
    %453 = arith.mulf %448, %452 : vector<8x32xf32>
    %454 = vector.broadcast %434 : vector<1x32xf32> to vector<8x32xf32>
    %455 = arith.mulf %453, %454 : vector<8x32xf32>
    %456 = vector.broadcast %435 : vector<1x32xf32> to vector<8x32xf32>
    %457 = arith.addf %455, %456 : vector<8x32xf32>
    %c0_161 = arith.constant 0 : index
    %c0_162 = arith.constant 0 : index
    %458 = vector.load %arg13[%c0_161, %c0_162] : memref<32x128xf32, #tpu.memory_space<vmem>>, vector<32x128xf32>
    %cst_163 = arith.constant dense<0.000000e+00> : vector<8x128xf32>
    %459 = tpu.matmul %457, %458, %cst_163 {dimension_numbers = #tpu.dot_dimension_numbers<[1], [0], [0], [1], [0, 0, 1, 1], [], []>} : vector<8x32xf32>, vector<32x128xf32>, vector<8x128xf32> -> vector<8x128xf32>
    %c0_164 = arith.constant 0 : index
    %c0_165 = arith.constant 0 : index
    %460 = vector.load %arg14[%c0_164, %c0_165] : memref<1x128xf32, #tpu.memory_space<vmem>>, vector<1x128xf32>
    %461 = vector.broadcast %460 : vector<1x128xf32> to vector<8x128xf32>
    %462 = arith.addf %459, %461 : vector<8x128xf32>
    %c0_166 = arith.constant 0 : index
    %c0_167 = arith.constant 0 : index
    %c0_168 = arith.constant 0 : index
    %463 = vector.load %arg15[%c0_166, %c0_167, %c0_168] : memref<1x8x128xf32, #tpu.memory_space<vmem>>, vector<1x8x128xf32>
    %464 = vector.shape_cast %463 : vector<1x8x128xf32> to vector<8x128xf32>
    %465 = vector.shape_cast %462 : vector<8x128xf32> to vector<1x8x128xf32>
    tpu.vector_store %arg15[%c0_166, %c0_167, %c0_168], %465 {strides = array<i32>} : memref<1x8x128xf32, #tpu.memory_space<vmem>>, vector<1x8x128xf32>,
    return
  }
  func.func @transform_0(%arg0: i32) -> (i32, i32, i32) {
    %c0_i32 = arith.constant 0 : i32
    %c0_i32_0 = arith.constant 0 : i32
    %c0_i32_1 = arith.constant 0 : i32
    return %arg0, %c0_i32, %c0_i32_0 : i32, i32, i32
  }
  func.func @transform_1(%arg0: i32) -> (i32, i32, i32) {
    %c0_i32 = arith.constant 0 : i32
    %c0_i32_0 = arith.constant 0 : i32
    %c0_i32_1 = arith.constant 0 : i32
    return %arg0, %c0_i32, %c0_i32_0 : i32, i32, i32
  }
  func.func @transform_2(%arg0: i32) -> (i32, i32, i32) {
    %c0_i32 = arith.constant 0 : i32
    %c0_i32_0 = arith.constant 0 : i32
    %c0_i32_1 = arith.constant 0 : i32
    return %arg0, %c0_i32, %c0_i32_0 : i32, i32, i32
  }
  func.func @transform_3(%arg0: i32) -> (i32, i32, i32) {
    %c0_i32 = arith.constant 0 : i32
    %c0_i32_0 = arith.constant 0 : i32
    %c0_i32_1 = arith.constant 0 : i32
    return %arg0, %c0_i32, %c0_i32_0 : i32, i32, i32
  }
  func.func @transform_4(%arg0: i32) -> (i32, i32, i32) {
    %c0_i32 = arith.constant 0 : i32
    %c0_i32_0 = arith.constant 0 : i32
    %c0_i32_1 = arith.constant 0 : i32
    %c0_i32_2 = arith.constant 0 : i32
    return %c0_i32, %c0_i32_0, %c0_i32_1 : i32, i32, i32
  }
  func.func @transform_5(%arg0: i32) -> (i32, i32, i32) {
    %c0_i32 = arith.constant 0 : i32
    %c0_i32_0 = arith.constant 0 : i32
    %c0_i32_1 = arith.constant 0 : i32
    %c0_i32_2 = arith.constant 0 : i32
    return %c0_i32, %c0_i32_0, %c0_i32_1 : i32, i32, i32
  }
  func.func @transform_6(%arg0: i32) -> (i32, i32, i32) {
    %c0_i32 = arith.constant 0 : i32
    %c0_i32_0 = arith.constant 0 : i32
    %c0_i32_1 = arith.constant 0 : i32
    %c0_i32_2 = arith.constant 0 : i32
    return %c0_i32, %c0_i32_0, %c0_i32_1 : i32, i32, i32
  }
  func.func @transform_7(%arg0: i32) -> (i32, i32, i32) {
    %c0_i32 = arith.constant 0 : i32
    %c0_i32_0 = arith.constant 0 : i32
    %c0_i32_1 = arith.constant 0 : i32
    %c0_i32_2 = arith.constant 0 : i32
    return %c0_i32, %c0_i32_0, %c0_i32_1 : i32, i32, i32
  }
  func.func @transform_8(%arg0: i32) -> (i32, i32, i32) {
    %c0_i32 = arith.constant 0 : i32
    %c0_i32_0 = arith.constant 0 : i32
    %c0_i32_1 = arith.constant 0 : i32
    %c0_i32_2 = arith.constant 0 : i32
    return %c0_i32, %c0_i32_0, %c0_i32_1 : i32, i32, i32
  }
  func.func @transform_9(%arg0: i32) -> (i32, i32, i32) {
    %c0_i32 = arith.constant 0 : i32
    %c0_i32_0 = arith.constant 0 : i32
    %c0_i32_1 = arith.constant 0 : i32
    %c0_i32_2 = arith.constant 0 : i32
    return %c0_i32, %c0_i32_0, %c0_i32_1 : i32, i32, i32
  }
  func.func @transform_10(%arg0: i32) -> (i32, i32, i32) {
    %c0_i32 = arith.constant 0 : i32
    %c0_i32_0 = arith.constant 0 : i32
    %c0_i32_1 = arith.constant 0 : i32
    %c0_i32_2 = arith.constant 0 : i32
    return %c0_i32, %c0_i32_0, %c0_i32_1 : i32, i32, i32
  }
  func.func @transform_11(%arg0: i32) -> (i32, i32, i32) {
    %c0_i32 = arith.constant 0 : i32
    %c0_i32_0 = arith.constant 0 : i32
    %c0_i32_1 = arith.constant 0 : i32
    %c0_i32_2 = arith.constant 0 : i32
    return %c0_i32, %c0_i32_0, %c0_i32_1 : i32, i32, i32
  }
  func.func @transform_12(%arg0: i32) -> (i32, i32) {
    %c0_i32 = arith.constant 0 : i32
    %c0_i32_0 = arith.constant 0 : i32
    %c0_i32_1 = arith.constant 0 : i32
    return %c0_i32, %c0_i32_0 : i32, i32
  }
  func.func @transform_13(%arg0: i32) -> (i32, i32) {
    %c0_i32 = arith.constant 0 : i32
    %c0_i32_0 = arith.constant 0 : i32
    %c0_i32_1 = arith.constant 0 : i32
    return %c0_i32, %c0_i32_0 : i32, i32
  }
  func.func @transform_14(%arg0: i32) -> (i32, i32, i32) {
    %c0_i32 = arith.constant 0 : i32
    %c0_i32_0 = arith.constant 0 : i32
    %c0_i32_1 = arith.constant 0 : i32
    return %arg0, %c0_i32, %c0_i32_0 : i32, i32, i32
  }
}

</mosaic_0001>

<bundles_post_ra>
// kernel: decoder_forward.1
= control target key start
LH: loop header
LB: loop body
LE: loop exit
PB: predicated region body
PF: predicated region fallthrough
CT: control target
= control target key end

     0   :  { %s3387_s0 = inlined_call_operand.vmem [shape: f32[2,8,32], index: 0, kind: input, shape index: {}]   ;;  %s3388_s1 = inlined_call_operand.vmem [shape: f32[2,8,32], index: 1, kind: input, shape index: {}]   ;;  %s3389_s2 = inlined_call_operand.vmem [shape: f32[2,8,8], index: 2, kind: input, shape index: {}]   ;;  %s3390_s3 = inlined_call_operand.vmem [shape: f32[2,8,8], index: 3, kind: input, shape index: {}]   ;;  %s3391_s4 = inlined_call_operand.vmem [shape: f32[2,32,96], index: 4, kind: input, shape index: {}]   ;;  %s3392_s5 = inlined_call_operand.vmem [shape: f32[2,32,32], index: 5, kind: input, shape index: {}]   ;;  %s3393_s6 = inlined_call_operand.vmem [shape: f32[2,32,32], index: 6, kind: input, shape index: {}]   ;;  %s3394_s7 = inlined_call_operand.vmem [shape: f32[2,32,64], index: 7, kind: input, shape index: {}]   ;;  %s3395_s8 = inlined_call_operand.vmem [shape: f32[2,32,32], index: 8, kind: input, shape index: {}]   ;;  %s3396_s9 = inlined_call_operand.vmem [shape: f32[2,32,64], index: 9, kind: input, shape index: {}]   ;;  %s3397_s10 = inlined_call_operand.vmem [shape: f32[2,64,32], index: 10, kind: input, shape index: {}]   ;;  %s3398_s11 = inlined_call_operand.vmem [shape: f32[2,13,128], index: 11, kind: input, shape index: {}]   ;;  %s3399_s12 = inlined_call_operand.vmem [shape: f32[32,128], index: 12, kind: input, shape index: {}]   ;;  %s3400_s13 = inlined_call_operand.vmem [shape: f32[1,128], index: 13, kind: input, shape index: {}]   ;;  %s3401_s14 = inlined_call_operand.hbm [shape: f32[2,8,128], index: 14, kind: output, shape index: {}]  }
   0x1   :  { %3435 = sst [smem:[#allocation12_spill]] %s3387_s0 }
   0x2   :  { %3436 = sst [smem:[#allocation13_spill]] %s3388_s1 }
   0x3   :  { %3437 = sst [smem:[#allocation14_spill]] %s3389_s2 }
   0x4   :  { %3438 = sst [smem:[#allocation15_spill]] %s3390_s3 }
   0x5   :  { %3439 = sst [smem:[#allocation16_spill]] %s3400_s13 }
   0x6   :  { %3440 = sst [smem:[#allocation17_spill]] %s3401_s14 }
   0x7   :  { %19 = vsyncpa [#allocation3], 0 }
   0x8   :  { %21 = vsyncpa [#allocation3 + $0x1], 0  ;;  %s2773_s29 = smov 0   ;;  %s2775_s30 = smov 0  }
   0x9   :  { %s2777_s15 = smov 0   ;;  %s2779_s16 = smov 0  }
   0xa LB: > { %3441 = sst [smem:[#allocation5_spill]] %s2669_s29  ;;  %s2794_s17 = sadd.s32 4294967295, %s2681_s16   ;;  %s2681_s16 = sphi %s2779_s16, %s3474_s16   ;;  %s2677_s15 = sphi %s2777_s15, %s3476_s15   ;;  %s2673_s30 = sphi %s2775_s30, %s3478_s30   ;;  %s2669_s29 = sphi %s2773_s29, %s3477_s29  }
   0xb   : > { %3442 = sst [smem:[#allocation6_spill]] %s2677_s15  ;;  %s2376_s18 = sadd.s32 4294967294, %s2681_s16  }
   0xc   : > { %3443 = sst [smem:[#allocation7_spill]] %s2681_s16  ;;  %s2798_s19 = sadd.s32 1, %s2681_s16  }
   0xd   : > { %3444 = sst [smem:[#allocation8_spill]] %s2798_s19  ;;  %s348_s20 = sadd.s32 1, %s2677_s15 }
   0xe   : > { %s345_s21 = ssub.s32 %s2681_s16, %s2798_s19  ;;  %p358_p0 = scmp.ne.s32.totalorder %s2677_s15, %s2673_s30 }
   0xf   : > { %p346_p1 = scmp.eq.s32.totalorder %s345_s21, 0  ;;  %p359_p2 = scmp.eq.s32.totalorder %s2794_s17, 1 }
  0x10   : > { %p364_p3 = scmp.ne.s32.totalorder %s2673_s30, %s2669_s29  ;;  %p365_p4 = scmp.eq.s32.totalorder %s2376_s18, 1 }
  0x11   : > { %s2809_s22 = scalar_select %p346_p1, %s2677_s15, %s348_s20  }
  0x12   : > { %p2811_p5 = por %p359_p2, %p358_p0  ;;  %p2815_p6 = por %p365_p4, %p364_p3 }
  0x13   : > { %3445 = sst [smem:[#allocation9_spill]] %s2809_s22  ;;  %p2379_p7 = scmp.ge.s32.totalorder %s2681_s16, 1 }
  0x14   : > { %s3446_s23 = scalar_select %p2811_p5, 1, 0 }
  0x15   : > { %s3448_s24 = scalar_select %p2815_p6, 1, 0 }
  0x16   : > { %3447 = sst [smem:[#allocation10_spill]] %s3446_s23  ;;  %p441_p8 = scmp.lt.s32.totalorder %s2681_s16, 3 }
  0x17   : > { %3449 = sst [smem:[#allocation11_spill]] %s3448_s24 }
  0x18   : > { %p442_p9 = pnand %p2379_p7, %p441_p8 }
  0x19   : > { %p498_p10 = scmp.lt.s32.totalorder (!%p442_p9), %s2794_s17, 1  ;;  %s3450_s0 = sld [smem:[#allocation12_spill]] (!%p442_p9) }
  0x1a   : > { %445 = sbr.rel (%p442_p9) target bundleno = 6456 (0x1938), region = 76  ;;  %s3419_s15 = smov (!%p442_p9), 112  }
  0x1b   : > { %s3413_s19 = smov (!%p442_p9), 96   ;;  %s3415_s22 = smov (!%p442_p9), 88  }
  0x1c   : > { %s3405_s20 = smov (!%p442_p9), 72   ;;  %s3425_s26 = smov (!%p442_p9), 120  }
  0x1d   : > { %s3451_s2 = sld [smem:[#allocation14_spill]] (!%p442_p9)  ;;  %s3408_s28 = smov (!%p442_p9), 64  }
  0x1e   : > { %s3410_s18 = smov (!%p442_p9), 56   ;;  %s3452_s1 = sld [smem:[#allocation13_spill]] (!%p442_p9) }
  0x1f   : > { %v523_v0 = vld [vmem:[%s3391_s4 + $0x18] sm:$0xff]  ;;  %v522_v1 = vld [vmem:[%s3391_s4 + $0x10] sm:$0xff]  ;;  %v521_v2 = vld [vmem:[%s3391_s4 + $0x8] sm:$0xff]  ;;  %s499_s21 = scalar_select %p498_p10, %s2794_s17, 1  ;;  %vm525_vm0 = vcmask 261120   ;;  %vm552_vm1 = vcmask 64512  }
  0x20   : > { %541 = vmatpush.msra.mxu0 %v523_v0  ;;  %v520_v3 = vld [vmem:[%s3391_s4] sm:$0xff]  ;;  %vm830_vm2 = vcmask 130048   ;;  %vm832_vm3 = vcmask 195584   ;;  %s3456_s3 = sld [smem:[#allocation15_spill]]  ;;  %vm1328_vm12 = vcmask 523264   ;;  %s3464_s14 = smov 56  }
  0x21   : > { %s2835_s25 = sshll.u32 %s499_s21, 3  ;;  %v2848_v5 = vld [vmem:[%s3398_s11] sm:$0xff]  ;;  %s3411_s21 = smov 80  }
  0x22   : > { %542 = vmatpush.msra.mxu0 %v522_v1  ;;  %s501_s27 = scalar_lea.vmem %s3450_s0, %s2835_s25  ;;  %v524_v6 = vperm.slane %v2848_v5, 0  ;;  %s3461_s0 = smov 8  }
  0x23   : > { %v2841_v4 = vld [vmem:[%s501_s27] sm:$0xff]  ;;  %s3417_s27 = smov 104   ;;  %s3465_s23 = smov 40  }
  0x24   : > { %543 = vmatpush.msra.mxu0 %v521_v2 }
  0x26   : > { %544 = vmatpush.msra.mxu0 %v520_v3 }
  0x27   : > { %2385 = vmatmul.msk.f32.vlgmr.msra.gmra.mxu0 %vm525_vm0, %v2841_v4 }
  0xa4   : > { %v546_v7 = vpop.f32.mrf.mxu0 }
  0xa5   : > { %v2851_v8 = vadd.f32 %v546_v7, %v524_v6 }
  0xa7   : > { %609 = vrot.lane.b32.xlu2 %v2851_v8, %s3419_s15  ;;  %550 = vrot.lane.b32.xlu1 %v2851_v8, %s3413_s19  ;;  %s3463_s15 = smov 24   ;;  %s3466_s19 = smov 48  }
  0xa8   : > { %581 = vrot.lane.b32.xlu0 %v2851_v8, %s3415_s22  ;;  %s513_s22 = scalar_lea.vmem %s3456_s3, %s2835_s25 }
  0xaf   : > { %641 = vrot.lane.b32.xlu2 %v2851_v8, %s3405_s20  ;;  %611 = vrot.lane.b32.xlu1 %v2851_v8, %s3411_s21  ;;  %s509_s20 = scalar_lea.vmem %s3451_s2, %s2835_s25  ;;  %s3458_s21 = smov 96  }
  0xb0   : > { %579 = vrot.lane.b32.xlu0 %v2851_v8, %s3425_s26  ;;  %v2880_v19 = vld [vmem:[%s509_s20] sm:$0xff]  ;;  %s3407_s20 = smov 40   ;;  %s3459_s26 = smov 80  }
  0xb1   : > { %s3462_s2 = smov 16  }
  0xb8   : > { %639 = vrot.lane.b32.xlu0 %v2851_v8, %s3417_s27  ;;  %s3460_s27 = smov 72  }
 0x101   : > { %v610_v9 = vpop.permute.xlu2 %609 }
 0x109   : > { %v642_v11 = vpop.permute.xlu2 %641 }
 0x119   : > { %v551_v10 = vpop.permute.xlu1 %550 }
 0x11a   : > { %v582_v12 = vpop.permute.xlu0 %581  ;;  %2386 = vmatpush.xpose.msk.msra.mxu1 %vm552_vm1, %v551_v10  ;;  %v837_v10 = vld [vmem:[%s3392_s5 + $0x18] sm:$0xff] }
 0x11b   : > { %2388 = vmatpush.xpose.msk.msra.mxu2 %vm552_vm1, %v582_v12  ;;  %v835_v12 = vld [vmem:[%s3392_s5 + $0x8] sm:$0xff] }
 0x11d   : > { %2387 = vmatmul.msk.f32.vlgmr.msra.gmra.mxu1 %vm552_vm1, %v2851_v8 }
 0x11e   : > { %2392 = vmatpush.xpose.msk.msrb.mxu1 %vm552_vm1, %v642_v11  ;;  %v836_v11 = vld [vmem:[%s3392_s5 + $0x10] sm:$0xff] }
 0x121   : > { %v612_v13 = vpop.permute.xlu1 %611 }
 0x122   : > { %v580_v14 = vpop.permute.xlu0 %579  ;;  %2390 = vmatpush.xpose.msk.msra.mxu3 %vm552_vm1, %v612_v13  ;;  %v834_v13 = vld [vmem:[%s3392_s5] sm:$0xff] }
 0x123   : > { %2389 = vmatmul.msk.f32.vlgmr.msra.gmra.mxu2 %vm552_vm1, %v580_v14 }
 0x125   : > { %2391 = vmatmul.msk.f32.vlgmr.msra.gmra.mxu3 %vm552_vm1, %v610_v9 }
 0x12a   : > { %v640_v15 = vpop.permute.xlu0 %639 }
 0x12b   : > { %2393 = vmatmul.msk.f32.vlgmr.msrb.gmra.mxu1 %vm552_vm1, %v640_v15 }
 0x19a   : > { %v574_v16 = vpop.f32.mrf.mxu1 }
 0x19b   : > { %v577_v28 = vmul.f32 0.35355338, %v574_v16 }
 0x19d   : > { %v578_v31 = vadd.f32 %v577_v28, %v2880_v19 }
 0x19f   : > { %v669_v32 = vsel %vm552_vm1, %v578_v31, -inf }
 0x1a6   : > { %v604_v17 = vpop.f32.mrf.mxu2 }
 0x1a7   : > { %v607_v18 = vmul.f32 0.35355338, %v604_v17 }
 0x1a8   : > { %v664_v20 = vpop.f32.mrf.mxu1  ;;  %v634_v21 = vpop.f32.mrf.mxu3 }
 0x1a9   : > { %v667_v22 = vmul.f32 0.35355338, %v664_v20  ;;  %v637_v23 = vmul.f32 0.35355338, %v634_v21  ;;  %v608_v24 = vadd.f32 %v607_v18, %v2880_v19 }
 0x1ab   : > { %v672_v25 = vsel %vm552_vm1, %v608_v24, -inf  ;;  %v668_v26 = vadd.f32 %v667_v22, %v2880_v19  ;;  %v638_v27 = vadd.f32 %v637_v23, %v2880_v19  ;;  %v838_v22 = vperm.slane %v2848_v5, 1 }
 0x1ac   : > { %673 = vmax.xlane.f32.xlu1 %v672_v25 }
 0x1ad   : > { %v678_v29 = vsel %vm552_vm1, %v668_v26, -inf  ;;  %v675_v30 = vsel %vm552_vm1, %v638_v27, -inf }
 0x1ae   : > { %679 = vmax.xlane.f32.xlu0 %v678_v29  ;;  %676 = vmax.xlane.f32.xlu2 %v675_v30 }
 0x1b6   : > { %670 = vmax.xlane.f32.xlu2 %v669_v32 }
 0x1c2   : > { %791 = vrot.lane.b32.xlu0 %v2851_v8, %s3407_s20  ;;  %s3409_s20 = smov 48  }
 0x21f   : > { %v674_v33 = vpop.xlane.xlu1 %673 }
 0x220   : > { %v682_v34 = vsub.f32 %v608_v24, %v674_v33 }
 0x221   : > { %v680_v35 = vpop.xlane.xlu0 %679  ;;  %v677_v36 = vpop.xlane.xlu2 %676 }
 0x222   : > { %v687_v37 = vmul.f32 1.442695, %v682_v34  ;;  %v684_v38 = vsub.f32 %v668_v26, %v680_v35  ;;  %v683_v39 = vsub.f32 %v638_v27, %v677_v36  ;;  %v2697_v27 = vmov 32.0  }
 0x224   : > { %2541 = vpow2.f32 %v687_v37  ;;  %v691_v40 = vmul.f32 1.442695, %v684_v38  ;;  %v689_v41 = vmul.f32 1.442695, %v683_v39  ;;  %v927_v38 = vld [vmem:[%s3394_s7 + $0x18] sm:$0xff]  ;;  %v926_v39 = vld [vmem:[%s3394_s7 + $0x10] sm:$0xff] }
 0x226   : > { %2543 = vpow2.f32 %v691_v40  ;;  %v925_v40 = vld [vmem:[%s3394_s7 + $0x8] sm:$0xff] }
 0x227   : > { %2545 = vpow2.f32 %v689_v41  ;;  %v924_v41 = vld [vmem:[%s3394_s7] sm:$0xff] }
 0x229   : > { %v671_v49 = vpop.xlane.xlu2 %670 }
 0x22a   : > { %v2542_v42 = vpop.eup %2541  ;;  %v681_v50 = vsub.f32 %v578_v31, %v671_v49 }
 0x22b   : > { %v696_v43 = vsel %vm552_vm1, %v2542_v42, 0.0 }
 0x22c   : > { %v2544_v44 = vpop.eup %2543  ;;  %697 = vadd.xlane.f32.xlu1 %v696_v43  ;;  %v685_v51 = vmul.f32 1.442695, %v681_v50  ;;  %v899_v43 = vld [vmem:[%s3393_s6 + $0x18] sm:$0xff] }
 0x22d   : > { %v2546_v45 = vpop.eup %2545  ;;  %v702_v46 = vsel %vm552_vm1, %v2544_v44, 0.0 }
 0x22e   : > { %703 = vadd.xlane.f32.xlu0 %v702_v46  ;;  %v699_v47 = vsel %vm552_vm1, %v2546_v45, 0.0  ;;  %2547 = vpow2.f32 %v685_v51  ;;  %v896_v46 = vld [vmem:[%s3393_s6] sm:$0xff] }
 0x22f   : > { %700 = vadd.xlane.f32.xlu2 %v699_v47 }
 0x234   : > { %v792_v48 = vpop.permute.xlu0 %791  ;;  %v2548_v52 = vpop.eup %2547 }
 0x235   : > { %812 = vmatpush.msra.mxu1 %v792_v48  ;;  %v693_v53 = vsel %vm552_vm1, %v2548_v52, 0.0 }
 0x242   : > { %713 = vrot.lane.b32.xlu0 %v2851_v8, %s3408_s28  ;;  %s3421_s28 = smov 16  }
 0x245   : > { %739 = vrot.lane.b32.xlu1 %v2851_v8, %s3410_s18  ;;  %s3427_s18 = smov 24  }
 0x247   : > { %765 = vrot.lane.b32.xlu2 %v2851_v8, %s3409_s20  ;;  %s3423_s20 = smov 8  }
 0x26f   : > { %694 = vadd.xlane.f32.xlu1 %v693_v53 }
 0x29f   : > { %v698_v61 = vpop.xlane.xlu1 %697 }
 0x2a1   : > { %v704_v54 = vpop.xlane.xlu0 %703 }
 0x2a2   : > { %2549 = vrcp.f32 %v704_v54  ;;  %v701_v55 = vpop.xlane.xlu2 %700 }
 0x2a3   : > { %2551 = vrcp.f32 %v701_v55 }
 0x2a4   : > { %2553 = vrcp.f32 %v698_v61 }
 0x2a8   : > { %v2550_v56 = vpop.eup %2549 }
 0x2a9   : > { %v2552_v57 = vpop.eup %2551  ;;  %v712_v58 = vmul.f32 %v2550_v56, %v2544_v44  ;;  %v898_v44 = vld [vmem:[%s3393_s6 + $0x10] sm:$0xff]  ;;  %v892_v56 = vperm.slane %v2848_v5, 2 }
 0x2aa   : > { %v766_v59 = vpop.permute.xlu2 %765  ;;  %v711_v60 = vmul.f32 %v2552_v57, %v2546_v45  ;;  %v2554_v62 = vpop.eup %2553  ;;  %v897_v45 = vld [vmem:[%s3393_s6 + $0x8] sm:$0xff] }
 0x2ab   : > { %786 = vmatpush.msrb.mxu0 %v766_v59  ;;  %2397 = vmatmul.msk.f32.vlgmr.msra.gmra.mxu1 %vm552_vm1, %v712_v58  ;;  %v710_v1 = vmul.f32 %v2554_v62, %v2542_v42  ;;  %v894_v59 = vperm.slane %v2848_v5, 3  ;;  %v928_v62 = vperm.slane %v2848_v5, 5 }
 0x2ac   : > { %2396 = vmatmul.msk.f32.vlgmr.msrb.gmra.mxu0 %vm552_vm1, %v711_v60 }
 0x2ad   : > { %944 = vmatpush.msra.mxu0 %v927_v38 }
 0x2af   : > { %945 = vmatpush.msra.mxu0 %v926_v39 }
 0x2b1   : > { %946 = vmatpush.msra.mxu0 %v925_v40 }
 0x2b3   : > { %947 = vmatpush.msra.mxu0 %v924_v41 }
 0x2b4   : > { %v714_v63 = vpop.permute.xlu0 %713 }
 0x2b5   : > { %734 = vmatpush.msrb.mxu2 %v714_v63 }
 0x2b7   : > { %v740_v0 = vpop.permute.xlu1 %739  ;;  %854 = vmatpush.msra.mxu2 %v837_v10 }
 0x2b8   : > { %760 = vmatpush.msrb.mxu3 %v740_v0 }
 0x2b9   : > { %2395 = vmatmul.msk.f32.vlgmr.msrb.gmra.mxu3 %vm552_vm1, %v710_v1  ;;  %855 = vmatpush.msra.mxu2 %v836_v11  ;;  %v900_v1 = vperm.slane %v2848_v5, 4 }
 0x2ba   : > { %916 = vmatpush.msra.mxu3 %v899_v43 }
 0x2bb   : > { %856 = vmatpush.msra.mxu2 %v835_v12 }
 0x2bc   : > { %917 = vmatpush.msra.mxu3 %v898_v44 }
 0x2bd   : > { %857 = vmatpush.msra.mxu2 %v834_v13 }
 0x2be   : > { %918 = vmatpush.msra.mxu3 %v897_v45 }
 0x2c0   : > { %919 = vmatpush.msra.mxu3 %v896_v46 }
 0x2e2   : > { %v695_v2 = vpop.xlane.xlu1 %694 }
 0x2e3   : > { %2555 = vrcp.f32 %v695_v2 }
 0x2e4   : > { %2557 = vrcp.f32 %v2697_v27 }
 0x2e9   : > { %v2556_v3 = vpop.eup %2555 }
 0x2ea   : > { %v709_v6 = vmul.f32 %v2556_v3, %v2548_v52  ;;  %v2558_v28 = vpop.eup %2557 }
 0x2eb   : > { %v867_v29 = vmul.f32 32.0, %v2558_v28  ;;  %vm871_vm4 = vweird.f32 %v2558_v28 }
 0x2ec   : > { %2394 = vmatmul.msk.f32.vlgmr.msrb.gmra.mxu2 %vm552_vm1, %v709_v6 }
 0x2ed   : > { %v868_v30 = vsub.f32 1.0, %v867_v29 }
 0x2ef   : > { %v869_v31 = vmul.f32 %v2558_v28, %v868_v30 }
 0x2f1   : > { %v870_v32 = vadd.f32 %v2558_v28, %v869_v31 }
 0x2f3   : > { %v2928_v33 = vsel %vm871_vm4, %v2558_v28, %v870_v32 }
 0x328   : > { %v814_v9 = vpop.f32.mrf.mxu1 }
 0x329   : > { %v788_v7 = vpop.f32.mrf.mxu0 }
 0x32a   : > { %822 = vrot.lane.b32.xlu0 %v788_v7, %s3421_s28  ;;  %s3455_s28 = smov 104  }
 0x33c   : > { %v762_v8 = vpop.f32.mrf.mxu3 }
 0x33d   : > { %818 = vrot.lane.b32.xlu2 %v762_v8, %s3423_s20  ;;  %s3454_s20 = smov 112  }
 0x345   : > { %826 = vrot.lane.b32.xlu2 %v814_v9, %s3427_s18  ;;  %s505_s18 = scalar_lea.vmem %s3452_s1, %s2835_s25  ;;  %s3457_s25 = smov 88  }
 0x346   : > { %v2948_v42 = vld [vmem:[%s505_s18] sm:$0xff]  ;;  %s3453_s18 = smov 120  }
 0x347   : > { %2400 = vmatmul.msk.f32.vlgmr.msra.gmra.mxu0 %vm525_vm0, %v2948_v42 }
 0x36f   : > { %v736_v16 = vpop.f32.mrf.mxu2 }
 0x397   : > { %v819_v14 = vpop.permute.xlu2 %818 }
 0x398   : > { %v829_v17 = vsel %vm552_vm1, %v736_v16, %v819_v14  ;;  %v2997_v14 = vld [vmem:[%s513_s22] sm:$0xff]  ;;  %s3467_s22 = smov 64  }
 0x39c   : > { %v823_v15 = vpop.permute.xlu0 %822 }
 0x39d   : > { %v831_v18 = vsel %vm830_vm2, %v829_v17, %v823_v15 }
 0x39f   : > { %v827_v20 = vpop.permute.xlu2 %826 }
 0x3a0   : > { %v833_v21 = vsel %vm832_vm3, %v831_v18, %v827_v20 }
 0x3a1   : > { %2398 = vmatmul.msk.f32.vlgmr.msra.gmra.mxu2 %vm525_vm0, %v833_v21 }
 0x3c4   : > { %v949_v63 = vpop.f32.mrf.mxu0 }
 0x3c5   : > { %v2972_v0 = vadd.f32 %v949_v63, %v928_v62 }
 0x3c7   : > { %982 = vrot.lane.b32.xlu1 %v2972_v0, %s3453_s18  ;;  %2401 = vmatpush.xpose.msk.msrb.mxu1 %vm552_vm1, %v2972_v0 }
 0x424   : > { %v859_v23 = vpop.f32.mrf.mxu2 }
 0x425   : > { %v860_v24 = vadd.f32 %v859_v23, %v838_v22 }
 0x427   : > { %v862_v25 = vadd.f32 %v860_v24, %v2841_v4 }
 0x429   : > { %v863_v26 = vsel %vm525_vm0, %v862_v25, 0.0 }
 0x42a   : > { %864 = vadd.xlane.f32.xlu0 %v863_v26 }
 0x439   : > { %v983_v6 = vpop.permute.xlu1 %982 }
 0x43a   : > { %2403 = vmatpush.xpose.msk.msrb.mxu2 %vm552_vm1, %v983_v6 }
 0x43e   : > { %1012 = vrot.lane.b32.xlu0 %v2972_v0, %s3454_s20 }
 0x49d   : > { %v865_v34 = vpop.xlane.xlu0 %864 }
 0x49e   : > { %v873_v35 = vmul.f32 %v2928_v33, %v865_v34 }
 0x4a0   : > { %v874_v36 = vsub.f32 %v862_v25, %v873_v35 }
 0x4a2   : > { %v875_v37 = vmul.f32 %v874_v36, %v874_v36 }
 0x4a4   : > { %v876_v4 = vsel %vm525_vm0, %v875_v37, 0.0 }
 0x4a5   : > { %877 = vadd.xlane.f32.xlu2 %v876_v4 }
 0x4b0   : > { %v1013_v7 = vpop.permute.xlu0 %1012 }
 0x4b1   : > { %2405 = vmatpush.xpose.msk.msrb.mxu3 %vm552_vm1, %v1013_v7 }
 0x518   : > { %v878_v47 = vpop.xlane.xlu2 %877 }
 0x519   : > { %v879_v48 = vmul.f32 %v878_v47, %v2928_v33 }
 0x51b   : > { %v880_v49 = vadd.f32 1e-05, %v879_v48 }
 0x51d   : > { %2559 = vrsqrt.f32 %v880_v49  ;;  %vm887_vm6 = vweird.f32 %v880_v49 }
 0x523   : > { %v2560_v50 = vpop.eup %2559 }
 0x524   : > { %v882_v51 = vmul.f32 %v2560_v50, %v880_v49  ;;  %vm888_vm5 = vweird.f32 %v2560_v50 }
 0x525   : > { %vm889_vm7 = vmor %vm887_vm6, %vm888_vm5 }
 0x526   : > { %v883_v52 = vmul.f32 %v2560_v50, %v882_v51 }
 0x528   : > { %v884_v53 = vmul.f32 0.5, %v883_v52 }
 0x52a   : > { %v885_v54 = vsub.f32 1.5, %v884_v53 }
 0x52c   : > { %v886_v55 = vmul.f32 %v2560_v50, %v885_v54 }
 0x52e   : > { %v890_v57 = vsel %vm889_vm7, %v2560_v50, %v886_v55 }
 0x52f   : > { %v891_v58 = vmul.f32 %v890_v57, %v874_v36 }
 0x531   : > { %v893_v60 = vmul.f32 %v892_v56, %v891_v58 }
 0x533   : > { %v2967_v61 = vadd.f32 %v894_v59, %v893_v60 }
 0x535   : > { %2399 = vmatmul.msk.f32.vlgmr.msra.gmra.mxu3 %vm525_vm0, %v2967_v61 }
 0x5b8   : > { %v921_v2 = vpop.f32.mrf.mxu3 }
 0x5b9   : > { %v922_v3 = vadd.f32 %v921_v2, %v900_v1 }
 0x5bb   : > { %1040 = vrot.lane.b32.xlu0 %v922_v3, %s3455_s28  ;;  %1010 = vrot.lane.b32.xlu1 %v922_v3, %s3454_s20 }
 0x5bc   : > { %980 = vrot.lane.b32.xlu2 %v922_v3, %s3453_s18  ;;  %2402 = vmatmul.msk.f32.vlgmr.msrb.gmra.mxu1 %vm552_vm1, %v922_v3 }
 0x5c3   : > { %1042 = vrot.lane.b32.xlu1 %v2972_v0, %s3455_s28 }
 0x616   : > { %v981_v8 = vpop.permute.xlu2 %980 }
 0x617   : > { %2404 = vmatmul.msk.f32.vlgmr.msrb.gmra.mxu2 %vm552_vm1, %v981_v8 }
 0x62d   : > { %v1011_v9 = vpop.permute.xlu1 %1010  ;;  %v1041_v11 = vpop.permute.xlu0 %1040 }
 0x62e   : > { %2406 = vmatmul.msk.f32.vlgmr.msrb.gmra.mxu3 %vm552_vm1, %v1011_v9  ;;  %v1236_v9 = vld [vmem:[%s3395_s8 + $0x18] sm:$0xff] }
 0x635   : > { %v1043_v10 = vpop.permute.xlu1 %1042 }
 0x636   : > { %2407 = vmatpush.xpose.msk.msrb.mxu0 %vm552_vm1, %v1043_v10  ;;  %v1235_v10 = vld [vmem:[%s3395_s8 + $0x10] sm:$0xff] }
 0x639   : > { %2408 = vmatmul.msk.f32.vlgmr.msrb.gmra.mxu0 %vm552_vm1, %v1041_v11  ;;  %v975_v15 = vpop.f32.mrf.mxu1  ;;  %v1234_v11 = vld [vmem:[%s3395_s8 + $0x8] sm:$0xff] }
 0x63a   : > { %v978_v17 = vmul.f32 0.35355338, %v975_v15 }
 0x63c   : > { %v979_v20 = vadd.f32 %v978_v17, %v2997_v14 }
 0x63e   : > { %v1070_v21 = vsel %vm552_vm1, %v979_v20, -inf }
 0x69a   : > { %v1005_v12 = vpop.f32.mrf.mxu2 }
 0x69b   : > { %v1008_v13 = vmul.f32 0.35355338, %v1005_v12  ;;  %v1233_v12 = vld [vmem:[%s3395_s8] sm:$0xff] }
 0x69d   : > { %v1009_v16 = vadd.f32 %v1008_v13, %v2997_v14 }
 0x69f   : > { %v1073_v18 = vsel %vm552_vm1, %v1009_v16, -inf }
 0x6a0   : > { %1074 = vmax.xlane.f32.xlu1 %v1073_v18 }
 0x6a8   : > { %1071 = vmax.xlane.f32.xlu1 %v1070_v21 }
 0x6b1   : > { %v1035_v22 = vpop.f32.mrf.mxu3 }
 0x6b2   : > { %v1038_v23 = vmul.f32 0.35355338, %v1035_v22  ;;  %v1237_v22 = vperm.slane %v2848_v5, 6 }
 0x6b4   : > { %v1039_v24 = vadd.f32 %v1038_v23, %v2997_v14 }
 0x6b6   : > { %v1065_v25 = vpop.f32.mrf.mxu0  ;;  %v1076_v26 = vsel %vm552_vm1, %v1039_v24, -inf }
 0x6b7   : > { %v1068_v27 = vmul.f32 0.35355338, %v1065_v25  ;;  %1077 = vmax.xlane.f32.xlu2 %v1076_v26 }
 0x6b9   : > { %v1069_v28 = vadd.f32 %v1068_v27, %v2997_v14 }
 0x6bb   : > { %v1079_v29 = vsel %vm552_vm1, %v1069_v28, -inf }
 0x6bc   : > { %1080 = vmax.xlane.f32.xlu0 %v1079_v29 }
 0x713   : > { %v1075_v30 = vpop.xlane.xlu1 %1074 }
 0x714   : > { %v1083_v31 = vsub.f32 %v1009_v16, %v1075_v30 }
 0x716   : > { %v1088_v32 = vmul.f32 1.442695, %v1083_v31 }
 0x718   : > { %2561 = vpow2.f32 %v1088_v32  ;;  %v1291_v32 = vld [vmem:[%s3396_s9 + $0x18] sm:$0xff] }
 0x71b   : > { %v1072_v46 = vpop.xlane.xlu1 %1071 }
 0x71c   : > { %v1082_v47 = vsub.f32 %v979_v20, %v1072_v46 }
 0x71e   : > { %v2562_v34 = vpop.eup %2561  ;;  %v1086_v48 = vmul.f32 1.442695, %v1082_v47 }
 0x71f   : > { %v1097_v35 = vsel %vm552_vm1, %v2562_v34, 0.0 }
 0x720   : > { %1098 = vadd.xlane.f32.xlu2 %v1097_v35  ;;  %v1288_v35 = vld [vmem:[%s3396_s9] sm:$0xff] }
 0x72a   : > { %v1078_v36 = vpop.xlane.xlu2 %1077 }
 0x72b   : > { %v1084_v37 = vsub.f32 %v1039_v24, %v1078_v36  ;;  %v1326_v36 = vld [vmem:[%s3397_s10 + $0x38] sm:$0xff] }
 0x72d   : > { %v1090_v4 = vmul.f32 1.442695, %v1084_v37  ;;  %v1325_v37 = vld [vmem:[%s3397_s10 + $0x30] sm:$0xff] }
 0x72f   : > { %2563 = vpow2.f32 %v1090_v4  ;;  %v1081_v38 = vpop.xlane.xlu0 %1080  ;;  %v1324_v4 = vld [vmem:[%s3397_s10 + $0x28] sm:$0xff] }
 0x730   : > { %v1085_v39 = vsub.f32 %v1069_v28, %v1081_v38 }
 0x732   : > { %v1092_v40 = vmul.f32 1.442695, %v1085_v39 }
 0x734   : > { %2565 = vpow2.f32 %v1092_v40  ;;  %v1323_v40 = vld [vmem:[%s3397_s10 + $0x20] sm:$0xff] }
 0x735   : > { %v2564_v41 = vpop.eup %2563  ;;  %2567 = vpow2.f32 %v1086_v48 }
 0x736   : > { %v1100_v43 = vsel %vm552_vm1, %v2564_v41, 0.0 }
 0x737   : > { %1101 = vadd.xlane.f32.xlu0 %v1100_v43  ;;  %v1322_v43 = vld [vmem:[%s3397_s10 + $0x18] sm:$0xff] }
 0x738   : > { %1140 = vrot.lane.b32.xlu2 %v2972_v0, %s3457_s25 }
 0x73a   : > { %v2566_v44 = vpop.eup %2565 }
 0x73b   : > { %v1103_v45 = vsel %vm552_vm1, %v2566_v44, 0.0  ;;  %v2568_v49 = vpop.eup %2567 }
 0x73c   : > { %1104 = vadd.xlane.f32.xlu1 %v1103_v45  ;;  %v1094_v50 = vsel %vm552_vm1, %v2568_v49, 0.0 }
 0x740   : > { %1114 = vrot.lane.b32.xlu2 %v2972_v0, %s3458_s21 }
 0x74b   : > { %1166 = vrot.lane.b32.xlu0 %v2972_v0, %s3459_s26 }
 0x755   : > { %1192 = vrot.lane.b32.xlu1 %v2972_v0, %s3460_s27 }
 0x775   : > { %1095 = vadd.xlane.f32.xlu0 %v1094_v50  ;;  %v519_v50 = vld [vmem:[%s3398_s11 + $0x8] sm:$0x1f] }
 0x793   : > { %v1099_v51 = vpop.xlane.xlu2 %1098 }
 0x794   : > { %2569 = vrcp.f32 %v1099_v51  ;;  %v1284_v51 = vperm.slane %v2848_v5, 7  ;;  %v1319_v5 = vld [vmem:[%s3397_s10] sm:$0xff] }
 0x79a   : > { %v2570_v52 = vpop.eup %2569 }
 0x79b   : > { %v1111_v53 = vmul.f32 %v2570_v52, %v2562_v34  ;;  %v1141_v54 = vpop.permute.xlu2 %1140  ;;  %v1289_v34 = vld [vmem:[%s3396_s9 + $0x8] sm:$0xff] }
 0x79c   : > { %1161 = vmatpush.msra.mxu2 %v1141_v54  ;;  %v1286_v54 = vperm.slane %v519_v50, 0 }
 0x79d   : > { %2410 = vmatmul.msk.f32.vlgmr.msra.gmra.mxu2 %vm552_vm1, %v1111_v53 }
 0x79e   : > { %1308 = vmatpush.msrb.mxu2 %v1291_v32 }
 0x7a3   : > { %v1115_v55 = vpop.permute.xlu2 %1114 }
 0x7a4   : > { %1135 = vmatpush.msra.mxu1 %v1115_v55 }
 0x7a6   : > { %1253 = vmatpush.msrb.mxu1 %v1236_v9 }
 0x7a8   : > { %1254 = vmatpush.msrb.mxu1 %v1235_v10 }
 0x7aa   : > { %v1102_v56 = vpop.xlane.xlu0 %1101  ;;  %1255 = vmatpush.msrb.mxu1 %v1234_v11 }
 0x7ab   : > { %2571 = vrcp.f32 %v1102_v56 }
 0x7ac   : > { %1256 = vmatpush.msrb.mxu1 %v1233_v12 }
 0x7af   : > { %v1105_v58 = vpop.xlane.xlu1 %1104 }
 0x7b0   : > { %2573 = vrcp.f32 %v1105_v58  ;;  %v1320_v58 = vld [vmem:[%s3397_s10 + $0x8] sm:$0xff] }
 0x7b1   : > { %v2572_v57 = vpop.eup %2571 }
 0x7b2   : > { %v1112_v59 = vmul.f32 %v2572_v57, %v2564_v41  ;;  %v1321_v57 = vld [vmem:[%s3397_s10 + $0x10] sm:$0xff] }
 0x7b6   : > { %v2574_v62 = vpop.eup %2573 }
 0x7b7   : > { %v1113_v63 = vmul.f32 %v2574_v62, %v2566_v44 }
 0x7bd   : > { %v1167_v60 = vpop.permute.xlu0 %1166 }
 0x7be   : > { %1187 = vmatpush.msra.mxu3 %v1167_v60 }
 0x7bf   : > { %2411 = vmatmul.msk.f32.vlgmr.msra.gmra.mxu3 %vm552_vm1, %v1112_v59  ;;  %v1292_v59 = vperm.slane %v519_v50, 1 }
 0x7c0   : > { %1340 = vmatpush.msrb.mxu3 %v1326_v36 }
 0x7c2   : > { %1341 = vmatpush.msrb.mxu3 %v1325_v37 }
 0x7c4   : > { %1342 = vmatpush.msrb.mxu3 %v1324_v4 }
 0x7c6   : > { %1343 = vmatpush.msrb.mxu3 %v1323_v40 }
 0x7c7   : > { %v1193_v0 = vpop.permute.xlu1 %1192 }
 0x7c8   : > { %1213 = vmatpush.msra.mxu0 %v1193_v0  ;;  %1344 = vmatpush.msrb.mxu3 %v1322_v43 }
 0x7c9   : > { %2412 = vmatmul.msk.f32.vlgmr.msra.gmra.mxu0 %vm552_vm1, %v1113_v63 }
 0x7ca   : > { %1345 = vmatpush.msrb.mxu3 %v1321_v57 }
 0x7cc   : > { %1346 = vmatpush.msrb.mxu3 %v1320_v58 }
 0x7ce   : > { %1347 = vmatpush.msrb.mxu3 %v1319_v5 }
 0x7e8   : > { %v1096_v1 = vpop.xlane.xlu0 %1095 }
 0x7e9   : > { %2575 = vrcp.f32 %v1096_v1  ;;  %v1327_v1 = vperm.slane %v519_v50, 2 }
 0x7ef   : > { %v2576_v2 = vpop.eup %2575 }
 0x7f0   : > { %v1110_v3 = vmul.f32 %v2576_v2, %v2568_v49 }
 0x7f2   : > { %2409 = vmatmul.msk.f32.vlgmr.msra.gmra.mxu1 %vm552_vm1, %v1110_v3 }
 0x820   : > { %v1163_v6 = vpop.f32.mrf.mxu2 }
 0x821   : > { %1219 = vrot.lane.b32.xlu1 %v1163_v6, %s3461_s0 }
 0x842   : > { %v1189_v7 = vpop.f32.mrf.mxu3 }
 0x843   : > { %1223 = vrot.lane.b32.xlu2 %v1189_v7, %s3462_s2 }
 0x846   : > { %v1215_v8 = vpop.f32.mrf.mxu0 }
 0x847   : > { %1227 = vrot.lane.b32.xlu1 %v1215_v8, %s3463_s15 }
 0x86f   : > { %v1137_v16 = vpop.f32.mrf.mxu1 }
 0x893   : > { %v1220_v13 = vpop.permute.xlu1 %1219 }
 0x894   : > { %v1230_v17 = vsel %vm552_vm1, %v1137_v16, %v1220_v13  ;;  %v2421_v13 = vld [vmem:[%s3391_s4 + $0x38] sm:$0xff]  ;;  %v2419_v16 = vld [vmem:[%s3391_s4 + $0x28] sm:$0xff] }
 0x895   : > { %1403 = vmatpush.msrb.mxu0 %v2421_v13 }
 0x89d   : > { %v1224_v15 = vpop.permute.xlu2 %1223 }
 0x89e   : > { %v1231_v18 = vsel %vm830_vm2, %v1230_v17, %v1224_v15  ;;  %v2420_v15 = vld [vmem:[%s3391_s4 + $0x30] sm:$0xff]  ;;  %v2418_v17 = vld [vmem:[%s3391_s4 + $0x20] sm:$0xff] }
 0x89f   : > { %1404 = vmatpush.msrb.mxu0 %v2420_v15 }
 0x8a1   : > { %1405 = vmatpush.msrb.mxu0 %v2419_v16 }
 0x8a3   : > { %1406 = vmatpush.msrb.mxu0 %v2418_v17 }
 0x8b9   : > { %v1228_v20 = vpop.permute.xlu1 %1227 }
 0x8ba   : > { %v1232_v21 = vsel %vm832_vm3, %v1231_v18, %v1228_v20 }
 0x8bb   : > { %2413 = vmatmul.msk.f32.vlgmr.msrb.gmra.mxu1 %vm525_vm0, %v1232_v21 }
 0x938   : > { %v1258_v23 = vpop.f32.mrf.mxu1 }
 0x939   : > { %v1259_v24 = vadd.f32 %v1258_v23, %v1237_v22 }
 0x93b   : > { %v1261_v25 = vadd.f32 %v1259_v24, %v2967_v61  ;;  %v1290_v61 = vld [vmem:[%s3396_s9 + $0x10] sm:$0xff] }
 0x93c   : > { %1309 = vmatpush.msrb.mxu2 %v1290_v61 }
 0x93d   : > { %v1262_v26 = vsel %vm525_vm0, %v1261_v25, 0.0 }
 0x93e   : > { %1263 = vadd.xlane.f32.xlu2 %v1262_v26  ;;  %1310 = vmatpush.msrb.mxu2 %v1289_v34  ;;  %v3113_v34 = vld [vmem:[%s3398_s11 + $0x10] sm:$0xff] }
 0x940   : > { %1311 = vmatpush.msrb.mxu2 %v1288_v35  ;;  %v1387_v35 = vperm.slane %v3113_v34, 0 }
 0x9b1   : > { %v1264_v27 = vpop.xlane.xlu2 %1263 }
 0x9b2   : > { %v1265_v28 = vmul.f32 %v1264_v27, %v2928_v33 }
 0x9b4   : > { %v1266_v29 = vsub.f32 %v1261_v25, %v1265_v28  ;;  %v1375_v28 = vperm.slane %v519_v50, 3 }
 0x9b6   : > { %v1267_v30 = vmul.f32 %v1266_v29, %v1266_v29 }
 0x9b8   : > { %v1268_v31 = vsel %vm525_vm0, %v1267_v30, 0.0 }
 0x9b9   : > { %1269 = vadd.xlane.f32.xlu1 %v1268_v31  ;;  %v1377_v31 = vperm.slane %v519_v50, 4 }
 0xa2c   : > { %v1270_v38 = vpop.xlane.xlu1 %1269 }
 0xa2d   : > { %v1271_v39 = vmul.f32 %v1270_v38, %v2928_v33 }
 0xa2f   : > { %v1272_v41 = vadd.f32 1e-05, %v1271_v39 }
 0xa31   : > { %2577 = vrsqrt.f32 %v1272_v41  ;;  %vm1279_vm9 = vweird.f32 %v1272_v41 }
 0xa37   : > { %v2578_v44 = vpop.eup %2577 }
 0xa38   : > { %v1274_v45 = vmul.f32 %v2578_v44, %v1272_v41  ;;  %vm1280_vm8 = vweird.f32 %v2578_v44 }
 0xa39   : > { %vm1281_vm10 = vmor %vm1279_vm9, %vm1280_vm8 }
 0xa3a   : > { %v1275_v46 = vmul.f32 %v2578_v44, %v1274_v45 }
 0xa3c   : > { %v1276_v47 = vmul.f32 0.5, %v1275_v46 }
 0xa3e   : > { %v1277_v48 = vsub.f32 1.5, %v1276_v47 }
 0xa40   : > { %v1278_v49 = vmul.f32 %v2578_v44, %v1277_v48 }
 0xa42   : > { %v1282_v52 = vsel %vm1281_vm10, %v2578_v44, %v1278_v49 }
 0xa43   : > { %v1283_v53 = vmul.f32 %v1282_v52, %v1266_v29 }
 0xa45   : > { %v1285_v55 = vmul.f32 %v1284_v51, %v1283_v53 }
 0xa47   : > { %v1287_v56 = vadd.f32 %v1286_v54, %v1285_v55 }
 0xa49   : > { %2414 = vmatmul.msk.f32.vlgmr.msrb.gmra.mxu2 %vm525_vm0, %v1287_v56 }
 0xacc   : > { %v1313_v60 = vpop.f32.mrf.mxu2 }
 0xacd   : > { %v1314_v62 = vadd.f32 %v1313_v60, %v1292_v59 }
 0xacf   : > { %vm1316_vm11 = vcmp.gt.f32.partialorder %v1314_v62, 0.0  ;;  %v1317_v63 = vmul.f32 0.01, %v1314_v62 }
 0xad1   : > { %v1318_v0 = vsel %vm1316_vm11, %v1314_v62, %v1317_v63 }
 0xad2   : > { %2415 = vmatmul.msk.f32.vlgmr.msrb.gmra.mxu3 %vm1328_vm12, %v1318_v0 }
 0xb55   : > { %v1349_v2 = vpop.f32.mrf.mxu3 }
 0xb56   : > { %v1350_v3 = vadd.f32 %v1349_v2, %v1327_v1 }
 0xb58   : > { %v1352_v6 = vadd.f32 %v1350_v3, %v1287_v56 }
 0xb5a   : > { %v1353_v7 = vsel %vm525_vm0, %v1352_v6, 0.0 }
 0xb5b   : > { %1354 = vadd.xlane.f32.xlu0 %v1353_v7 }
 0xbce   : > { %v1355_v8 = vpop.xlane.xlu0 %1354 }
 0xbcf   : > { %v1356_v9 = vmul.f32 %v1355_v8, %v2928_v33 }
 0xbd1   : > { %v1357_v10 = vsub.f32 %v1352_v6, %v1356_v9 }
 0xbd3   : > { %v1358_v11 = vmul.f32 %v1357_v10, %v1357_v10 }
 0xbd5   : > { %v1359_v12 = vsel %vm525_vm0, %v1358_v11, 0.0 }
 0xbd6   : > { %1360 = vadd.xlane.f32.xlu0 %v1359_v12 }
 0xc49   : > { %v1361_v18 = vpop.xlane.xlu0 %1360 }
 0xc4a   : > { %v1362_v20 = vmul.f32 %v1361_v18, %v2928_v33 }
 0xc4c   : > { %v1363_v21 = vadd.f32 1e-05, %v1362_v20 }
 0xc4e   : > { %2579 = vrsqrt.f32 %v1363_v21  ;;  %vm1370_vm14 = vweird.f32 %v1363_v21 }
 0xc54   : > { %v2580_v22 = vpop.eup %2579 }
 0xc55   : > { %v1365_v23 = vmul.f32 %v2580_v22, %v1363_v21  ;;  %vm1371_vm13 = vweird.f32 %v2580_v22 }
 0xc56   : > { %vm1372_vm15 = vmor %vm1370_vm14, %vm1371_vm13 }
 0xc57   : > { %v1366_v24 = vmul.f32 %v2580_v22, %v1365_v23 }
 0xc59   : > { %v1367_v25 = vmul.f32 0.5, %v1366_v24 }
 0xc5b   : > { %v1368_v26 = vsub.f32 1.5, %v1367_v25 }
 0xc5d   : > { %v1369_v27 = vmul.f32 %v2580_v22, %v1368_v26 }
 0xc5f   : > { %v1373_v29 = vsel %vm1372_vm15, %v2580_v22, %v1369_v27 }
 0xc60   : > { %v1374_v30 = vmul.f32 %v1373_v29, %v1357_v10 }
 0xc62   : > { %v1376_v32 = vmul.f32 %v1375_v28, %v1374_v30 }
 0xc64   : > { %v3106_v61 = vadd.f32 %v1377_v31, %v1376_v32 }
 0xc66   : > { %2422 = vmatmul.msk.f32.vlgmr.msrb.gmra.mxu0 %vm525_vm0, %v3106_v61 }
 0xce3   : > { %v1408_v36 = vpop.f32.mrf.mxu0 }
 0xce4   : > { %v3116_v37 = vadd.f32 %v1408_v36, %v1387_v35 }
 0xce6   : > { %1412 = vrot.lane.b32.xlu1 %v3116_v37, %s3458_s21  ;;  %1440 = vrot.lane.b32.xlu2 %v3116_v37, %s3453_s18 }
 0xce7   : > { %1442 = vrot.lane.b32.xlu0 %v3116_v37, %s3457_s25 }
 0xcee   : > { %1500 = vrot.lane.b32.xlu1 %v3116_v37, %s3455_s28  ;;  %1502 = vrot.lane.b32.xlu2 %v3116_v37, %s3460_s27 }
 0xcef   : > { %1472 = vrot.lane.b32.xlu0 %v3116_v37, %s3459_s26 }
 0xcf7   : > { %1470 = vrot.lane.b32.xlu0 %v3116_v37, %s3454_s20 }
 0xd40   : > { %v1441_v4 = vpop.permute.xlu2 %1440 }
 0xd48   : > { %v1503_v39 = vpop.permute.xlu2 %1502 }
 0xd58   : > { %v1413_v38 = vpop.permute.xlu1 %1412 }
 0xd59   : > { %v1443_v40 = vpop.permute.xlu0 %1442  ;;  %2423 = vmatpush.xpose.msk.msra.mxu1 %vm552_vm1, %v1413_v38 }
 0xd5a   : > { %2425 = vmatpush.xpose.msk.msra.mxu2 %vm552_vm1, %v1443_v40  ;;  %v2438_v40 = vld [vmem:[%s3392_s5 + $0x38] sm:$0xff] }
 0xd5c   : > { %2424 = vmatmul.msk.f32.vlgmr.msra.gmra.mxu1 %vm552_vm1, %v3116_v37 }
 0xd5d   : > { %2429 = vmatpush.xpose.msk.msrb.mxu1 %vm552_vm1, %v1503_v39  ;;  %2426 = vmatmul.msk.f32.vlgmr.msra.gmra.mxu2 %vm552_vm1, %v1441_v4 }
 0xd60   : > { %v1501_v43 = vpop.permute.xlu1 %1500 }
 0xd61   : > { %v1473_v41 = vpop.permute.xlu0 %1472 }
 0xd62   : > { %2427 = vmatpush.xpose.msk.msra.mxu0 %vm552_vm1, %v1473_v41  ;;  %v2437_v41 = vld [vmem:[%s3392_s5 + $0x30] sm:$0xff] }
 0xd64   : > { %2430 = vmatmul.msk.f32.vlgmr.msrb.gmra.mxu1 %vm552_vm1, %v1501_v43  ;;  %v2436_v43 = vld [vmem:[%s3392_s5 + $0x28] sm:$0xff] }
 0xd69   : > { %v1471_v44 = vpop.permute.xlu0 %1470 }
 0xd6a   : > { %2428 = vmatmul.msk.f32.vlgmr.msra.gmra.mxu0 %vm552_vm1, %v1471_v44  ;;  %v2435_v44 = vld [vmem:[%s3392_s5 + $0x20] sm:$0xff] }
 0xdd9   : > { %v1435_v45 = vpop.f32.mrf.mxu1 }
 0xdda   : > { %v1438_v52 = vmul.f32 0.35355338, %v1435_v45 }
 0xddc   : > { %v1439_v57 = vadd.f32 %v1438_v52, %v2880_v19  ;;  %v1698_v52 = vperm.slane %v3113_v34, 1 }
 0xdde   : > { %v1530_v59 = vsel %vm552_vm1, %v1439_v57, -inf }
 0xde0   : > { %v1465_v46 = vpop.f32.mrf.mxu2 }
 0xde1   : > { %v1468_v47 = vmul.f32 0.35355338, %v1465_v46  ;;  %v1525_v48 = vpop.f32.mrf.mxu1 }
 0xde2   : > { %v1528_v49 = vmul.f32 0.35355338, %v1525_v48 }
 0xde3   : > { %v1469_v50 = vadd.f32 %v1468_v47, %v2880_v19 }
 0xde4   : > { %v1529_v51 = vadd.f32 %v1528_v49, %v2880_v19 }
 0xde5   : > { %v1533_v53 = vsel %vm552_vm1, %v1469_v50, -inf }
 0xde6   : > { %1534 = vmax.xlane.f32.xlu2 %v1533_v53  ;;  %v1539_v54 = vsel %vm552_vm1, %v1529_v51, -inf }
 0xde7   : > { %v1495_v55 = vpop.f32.mrf.mxu0  ;;  %1540 = vmax.xlane.f32.xlu1 %v1539_v54 }
 0xde8   : > { %v1498_v56 = vmul.f32 0.35355338, %v1495_v55 }
 0xdea   : > { %v1499_v58 = vadd.f32 %v1498_v56, %v2880_v19 }
 0xdec   : > { %v1536_v5 = vsel %vm552_vm1, %v1499_v58, -inf }
 0xded   : > { %1537 = vmax.xlane.f32.xlu0 %v1536_v5 }
 0xdee   : > { %1531 = vmax.xlane.f32.xlu2 %v1530_v59 }
 0xe59   : > { %v1535_v60 = vpop.xlane.xlu2 %1534 }
 0xe5a   : > { %v1543_v62 = vsub.f32 %v1469_v50, %v1535_v60  ;;  %v1541_v63 = vpop.xlane.xlu1 %1540 }
 0xe5b   : > { %v1545_v0 = vsub.f32 %v1529_v51, %v1541_v63  ;;  %v2446_v63 = vld [vmem:[%s3394_s7 + $0x28] sm:$0xff] }
 0xe5c   : > { %v1548_v1 = vmul.f32 1.442695, %v1543_v62  ;;  %v2448_v62 = vld [vmem:[%s3394_s7 + $0x38] sm:$0xff] }
 0xe5d   : > { %v1552_v2 = vmul.f32 1.442695, %v1545_v0  ;;  %v2445_v0 = vld [vmem:[%s3394_s7 + $0x20] sm:$0xff] }
 0xe5e   : > { %2581 = vpow2.f32 %v1548_v1  ;;  %v2443_v1 = vld [vmem:[%s3393_s6 + $0x38] sm:$0xff] }
 0xe5f   : > { %2583 = vpow2.f32 %v1552_v2  ;;  %v2442_v2 = vld [vmem:[%s3393_s6 + $0x30] sm:$0xff] }
 0xe60   : > { %v1538_v3 = vpop.xlane.xlu0 %1537 }
 0xe61   : > { %v1544_v6 = vsub.f32 %v1499_v58, %v1538_v3  ;;  %v1532_v13 = vpop.xlane.xlu2 %1531  ;;  %v2441_v3 = vld [vmem:[%s3393_s6 + $0x28] sm:$0xff] }
 0xe62   : > { %v1542_v15 = vsub.f32 %v1439_v57, %v1532_v13 }
 0xe63   : > { %v1550_v7 = vmul.f32 1.442695, %v1544_v6  ;;  %v2440_v6 = vld [vmem:[%s3393_s6 + $0x20] sm:$0xff] }
 0xe64   : > { %v2582_v8 = vpop.eup %2581  ;;  %v1546_v16 = vmul.f32 1.442695, %v1542_v15  ;;  %v1745_v15 = vperm.slane %v3113_v34, 2 }
 0xe65   : > { %v2584_v9 = vpop.eup %2583  ;;  %2585 = vpow2.f32 %v1550_v7  ;;  %v1557_v19 = vsel %vm552_vm1, %v2582_v8, 0.0 }
 0xe66   : > { %1558 = vadd.xlane.f32.xlu0 %v1557_v19  ;;  %v1563_v10 = vsel %vm552_vm1, %v2584_v9, 0.0  ;;  %2587 = vpow2.f32 %v1546_v16 }
 0xe67   : > { %1564 = vadd.xlane.f32.xlu1 %v1563_v10 }
 0xe6b   : > { %v2586_v11 = vpop.eup %2585 }
 0xe6c   : > { %v1560_v12 = vsel %vm552_vm1, %v2586_v11, 0.0  ;;  %v2588_v17 = vpop.eup %2587 }
 0xe6d   : > { %1561 = vadd.xlane.f32.xlu2 %v1560_v12  ;;  %v1554_v18 = vsel %vm552_vm1, %v2588_v17, 0.0 }
 0xe7a   : > { %1600 = vrot.lane.b32.xlu0 %v3116_v37, %s3464_s14  ;;  %s3470_s14 = sld [smem:[#allocation16_spill]] }
 0xe80   : > { %1652 = vrot.lane.b32.xlu1 %v3116_v37, %s3465_s23 }
 0xe85   : > { %1626 = vrot.lane.b32.xlu2 %v3116_v37, %s3466_s19 }
 0xe8d   : > { %1574 = vrot.lane.b32.xlu2 %v3116_v37, %s3467_s22 }
 0xea4   : > { %1555 = vadd.xlane.f32.xlu0 %v1554_v18  ;;  %v1747_v18 = vperm.slane %v3113_v34, 3 }
 0xed9   : > { %v1559_v20 = vpop.xlane.xlu0 %1558 }
 0xeda   : > { %v1565_v22 = vpop.xlane.xlu1 %1564 }
 0xee0   : > { %v1562_v21 = vpop.xlane.xlu2 %1561 }
 0xee1   : > { %2589 = vrcp.f32 %v1562_v21 }
 0xee2   : > { %2591 = vrcp.f32 %v1559_v20 }
 0xee3   : > { %2593 = vrcp.f32 %v1565_v22  ;;  %v1783_v22 = vperm.slane %v3113_v34, 5 }
 0xee7   : > { %v2590_v23 = vpop.eup %2589 }
 0xee8   : > { %v1572_v24 = vmul.f32 %v2590_v23, %v2586_v11  ;;  %v1627_v25 = vpop.permute.xlu2 %1626  ;;  %v2592_v26 = vpop.eup %2591 }
 0xee9   : > { %1647 = vmatpush.msrb.mxu0 %v1627_v25  ;;  %v1571_v27 = vmul.f32 %v2592_v26, %v2582_v8  ;;  %v2594_v29 = vpop.eup %2593  ;;  %v1754_v25 = vperm.slane %v3113_v34, 4 }
 0xeea   : > { %2433 = vmatmul.msk.f32.vlgmr.msrb.gmra.mxu0 %vm552_vm1, %v1572_v24  ;;  %v1573_v31 = vmul.f32 %v2594_v29, %v2584_v9 }
 0xeeb   : > { %1796 = vmatpush.msra.mxu0 %v2448_v62 }
 0xeec   : > { %v1601_v28 = vpop.permute.xlu0 %1600 }
 0xeed   : > { %1621 = vmatpush.msra.mxu3 %v1601_v28 }
 0xeee   : > { %2432 = vmatmul.msk.f32.vlgmr.msra.gmra.mxu3 %vm552_vm1, %v1571_v27 }
 0xeef   : > { %1770 = vmatpush.msrb.mxu3 %v2443_v1 }
 0xef0   : > { %v1575_v30 = vpop.permute.xlu2 %1574 }
 0xef1   : > { %1595 = vmatpush.msrb.mxu2 %v1575_v30  ;;  %1771 = vmatpush.msrb.mxu3 %v2442_v2 }
 0xef2   : > { %v1653_v32 = vpop.permute.xlu1 %1652 }
 0xef3   : > { %1673 = vmatpush.msra.mxu1 %v1653_v32  ;;  %1714 = vmatpush.msra.mxu2 %v2438_v40 }
 0xef4   : > { %2434 = vmatmul.msk.f32.vlgmr.msra.gmra.mxu1 %vm552_vm1, %v1573_v31  ;;  %1772 = vmatpush.msrb.mxu3 %v2441_v3 }
 0xef5   : > { %1715 = vmatpush.msra.mxu2 %v2437_v41 }
 0xef6   : > { %1773 = vmatpush.msrb.mxu3 %v2440_v6 }
 0xef7   : > { %1716 = vmatpush.msra.mxu2 %v2436_v43 }
 0xef9   : > { %1717 = vmatpush.msra.mxu2 %v2435_v44 }
 0xf17   : > { %v1556_v35 = vpop.xlane.xlu0 %1555 }
 0xf18   : > { %2595 = vrcp.f32 %v1556_v35 }
 0xf1e   : > { %v2596_v36 = vpop.eup %2595 }
 0xf1f   : > { %v1570_v37 = vmul.f32 %v2596_v36, %v2588_v17 }
 0xf21   : > { %2431 = vmatmul.msk.f32.vlgmr.msrb.gmra.mxu2 %vm552_vm1, %v1570_v37 }
 0xf67   : > { %v1649_v4 = vpop.f32.mrf.mxu0 }
 0xf68   : > { %1683 = vrot.lane.b32.xlu2 %v1649_v4, %s3462_s2 }
 0xf71   : > { %v1623_v38 = vpop.f32.mrf.mxu3  ;;  %v1675_v39 = vpop.f32.mrf.mxu1 }
 0xf72   : > { %1679 = vrot.lane.b32.xlu1 %v1623_v38, %s3461_s0 }
 0xf7a   : > { %1687 = vrot.lane.b32.xlu1 %v1675_v39, %s3463_s15 }
 0xfa4   : > { %v1597_v46 = vpop.f32.mrf.mxu2 }
 0xfc2   : > { %v1684_v48 = vpop.permute.xlu2 %1683 }
 0xfe4   : > { %v1680_v45 = vpop.permute.xlu1 %1679 }
 0xfe5   : > { %v1690_v47 = vsel %vm552_vm1, %v1597_v46, %v1680_v45 }
 0xfe6   : > { %v1691_v50 = vsel %vm830_vm2, %v1690_v47, %v1684_v48 }
 0xfec   : > { %v1688_v49 = vpop.permute.xlu1 %1687 }
 0xfed   : > { %v1692_v51 = vsel %vm832_vm3, %v1691_v50, %v1688_v49 }
 0xfee   : > { %2439 = vmatmul.msk.f32.vlgmr.msra.gmra.mxu2 %vm525_vm0, %v1692_v51 }
0x1071   : > { %v1719_v53 = vpop.f32.mrf.mxu2 }
0x1072   : > { %v1720_v54 = vadd.f32 %v1719_v53, %v1698_v52 }
0x1074   : > { %v1722_v55 = vadd.f32 %v1720_v54, %v3106_v61  ;;  %v2447_v61 = vld [vmem:[%s3394_s7 + $0x30] sm:$0xff] }
0x1075   : > { %1797 = vmatpush.msra.mxu0 %v2447_v61 }
0x1076   : > { %v1723_v56 = vsel %vm525_vm0, %v1722_v55, 0.0 }
0x1077   : > { %1724 = vadd.xlane.f32.xlu2 %v1723_v56  ;;  %1798 = vmatpush.msra.mxu0 %v2446_v63 }
0x1079   : > { %1799 = vmatpush.msra.mxu0 %v2445_v0 }
0x107a   : > { %2449 = vmatmul.msk.f32.vlgmr.msra.gmra.mxu0 %vm525_vm0, %v2948_v42 }
0x10ea   : > { %v1725_v57 = vpop.xlane.xlu2 %1724 }
0x10eb   : > { %v1726_v58 = vmul.f32 %v1725_v57, %v2928_v33 }
0x10ed   : > { %v1727_v5 = vsub.f32 %v1722_v55, %v1726_v58 }
0x10ef   : > { %v1728_v59 = vmul.f32 %v1727_v5, %v1727_v5 }
0x10f1   : > { %v1729_v60 = vsel %vm525_vm0, %v1728_v59, 0.0 }
0x10f2   : > { %1730 = vadd.xlane.f32.xlu1 %v1729_v60 }
0x10f7   : > { %v1801_v23 = vpop.f32.mrf.mxu0 }
0x10f8   : > { %v3223_v24 = vadd.f32 %v1801_v23, %v1783_v22 }
0x10fa   : > { %1834 = vrot.lane.b32.xlu0 %v3223_v24, %s3453_s18  ;;  %2450 = vmatpush.xpose.msk.msrb.mxu1 %vm552_vm1, %v3223_v24 }
0x1102   : > { %1864 = vrot.lane.b32.xlu0 %v3223_v24, %s3454_s20 }
0x110a   : > { %1894 = vrot.lane.b32.xlu0 %v3223_v24, %s3455_s28 }
0x1165   : > { %v1731_v42 = vpop.xlane.xlu1 %1730 }
0x1166   : > { %v1732_v7 = vmul.f32 %v1731_v42, %v2928_v33 }
0x1168   : > { %v1733_v8 = vadd.f32 1e-05, %v1732_v7 }
0x116a   : > { %2597 = vrsqrt.f32 %v1733_v8  ;;  %vm1740_vm5 = vweird.f32 %v1733_v8 }
0x116c   : > { %v1835_v28 = vpop.permute.xlu0 %1834 }
0x116d   : > { %2452 = vmatpush.xpose.msk.msrb.mxu2 %vm552_vm1, %v1835_v28  ;;  %v2465_v28 = vld [vmem:[%s3395_s8 + $0x38] sm:$0xff] }
0x1170   : > { %v2598_v9 = vpop.eup %2597 }
0x1171   : > { %v1735_v19 = vmul.f32 %v2598_v9, %v1733_v8  ;;  %vm1741_vm4 = vweird.f32 %v2598_v9 }
0x1172   : > { %vm1742_vm6 = vmor %vm1740_vm5, %vm1741_vm4 }
0x1173   : > { %v1736_v10 = vmul.f32 %v2598_v9, %v1735_v19 }
0x1174   : > { %v1865_v29 = vpop.permute.xlu0 %1864 }
0x1175   : > { %v1737_v11 = vmul.f32 0.5, %v1736_v10  ;;  %2454 = vmatpush.xpose.msk.msra.mxu3 %vm552_vm1, %v1865_v29  ;;  %v2464_v29 = vld [vmem:[%s3395_s8 + $0x30] sm:$0xff] }
0x1177   : > { %v1738_v12 = vsub.f32 1.5, %v1737_v11 }
0x1179   : > { %v1739_v13 = vmul.f32 %v2598_v9, %v1738_v12 }
0x117b   : > { %v1743_v16 = vsel %vm1742_vm6, %v2598_v9, %v1739_v13 }
0x117c   : > { %v1744_v17 = vmul.f32 %v1743_v16, %v1727_v5  ;;  %v1895_v30 = vpop.permute.xlu0 %1894 }
0x117d   : > { %2456 = vmatpush.xpose.msk.msrb.mxu0 %vm552_vm1, %v1895_v30  ;;  %v2463_v30 = vld [vmem:[%s3395_s8 + $0x28] sm:$0xff] }
0x117e   : > { %v1746_v20 = vmul.f32 %v1745_v15, %v1744_v17 }
0x1180   : > { %v3218_v21 = vadd.f32 %v1747_v18, %v1746_v20 }
0x1182   : > { %2444 = vmatmul.msk.f32.vlgmr.msrb.gmra.mxu3 %vm525_vm0, %v3218_v21 }
0x1205   : > { %v1775_v26 = vpop.f32.mrf.mxu3 }
0x1206   : > { %v1776_v27 = vadd.f32 %v1775_v26, %v1754_v25 }
0x1208   : > { %1892 = vrot.lane.b32.xlu0 %v1776_v27, %s3455_s28  ;;  %1862 = vrot.lane.b32.xlu1 %v1776_v27, %s3454_s20  ;;  %s495_s28 = sand.u32 1, %s2673_s30  }
0x1209   : > { %1832 = vrot.lane.b32.xlu2 %v1776_v27, %s3453_s18  ;;  %2451 = vmatmul.msk.f32.vlgmr.msrb.gmra.mxu1 %vm552_vm1, %v1776_v27  ;;  %s2266_s1 = scalar_lea.sflag [#allocation3], %s495_s28 }
0x1263   : > { %v1833_v31 = vpop.permute.xlu2 %1832 }
0x1264   : > { %2453 = vmatmul.msk.f32.vlgmr.msrb.gmra.mxu2 %vm552_vm1, %v1833_v31  ;;  %v2462_v31 = vld [vmem:[%s3395_s8 + $0x20] sm:$0xff] }
0x127a   : > { %v1863_v32 = vpop.permute.xlu1 %1862  ;;  %v1893_v35 = vpop.permute.xlu0 %1892 }
0x127b   : > { %2455 = vmatmul.msk.f32.vlgmr.msra.gmra.mxu3 %vm552_vm1, %v1863_v32  ;;  %2457 = vmatmul.msk.f32.vlgmr.msrb.gmra.mxu0 %vm552_vm1, %v1893_v35 }
0x1286   : > { %v1827_v4 = vpop.f32.mrf.mxu1 }
0x1287   : > { %v1830_v39 = vmul.f32 0.35355338, %v1827_v4 }
0x1289   : > { %v1831_v41 = vadd.f32 %v1830_v39, %v2997_v14 }
0x128b   : > { %v1922_v43 = vsel %vm552_vm1, %v1831_v41, -inf }
0x12e7   : > { %v1857_v36 = vpop.f32.mrf.mxu2 }
0x12e8   : > { %v1860_v37 = vmul.f32 0.35355338, %v1857_v36 }
0x12ea   : > { %v1861_v38 = vadd.f32 %v1860_v37, %v2997_v14 }
0x12ec   : > { %v1925_v40 = vsel %vm552_vm1, %v1861_v38, -inf }
0x12ed   : > { %1926 = vmax.xlane.f32.xlu0 %v1925_v40  ;;  %v2090_v40 = vperm.slane %v3113_v34, 6 }
0x12f5   : > { %1923 = vmax.xlane.f32.xlu0 %v1922_v43 }
0x12f8   : > { %v1917_v44 = vpop.f32.mrf.mxu0 }
0x12f9   : > { %v1920_v45 = vmul.f32 0.35355338, %v1917_v44 }
0x12fb   : > { %v1921_v46 = vadd.f32 %v1920_v45, %v2997_v14 }
0x12fd   : > { %v1931_v47 = vsel %vm552_vm1, %v1921_v46, -inf }
0x12fe   : > { %v1887_v48 = vpop.f32.mrf.mxu3  ;;  %1932 = vmax.xlane.f32.xlu1 %v1931_v47 }
0x12ff   : > { %v1890_v49 = vmul.f32 0.35355338, %v1887_v48 }
0x1301   : > { %v1891_v50 = vadd.f32 %v1890_v49, %v2997_v14 }
0x1303   : > { %v1928_v51 = vsel %vm552_vm1, %v1891_v50, -inf }
0x1304   : > { %1929 = vmax.xlane.f32.xlu2 %v1928_v51  ;;  %v2470_v51 = vld [vmem:[%s3396_s9 + $0x38] sm:$0xff] }
0x1360   : > { %v1927_v52 = vpop.xlane.xlu0 %1926 }
0x1361   : > { %v1935_v53 = vsub.f32 %v1861_v38, %v1927_v52  ;;  %v2468_v52 = vld [vmem:[%s3396_s9 + $0x28] sm:$0xff] }
0x1363   : > { %v1940_v54 = vmul.f32 1.442695, %v1935_v53  ;;  %v2467_v53 = vld [vmem:[%s3396_s9 + $0x20] sm:$0xff] }
0x1365   : > { %2599 = vpow2.f32 %v1940_v54  ;;  %v2479_v54 = vld [vmem:[%s3397_s10 + $0x78] sm:$0xff] }
0x1368   : > { %v1924_v1 = vpop.xlane.xlu0 %1923 }
0x1369   : > { %v1934_v2 = vsub.f32 %v1831_v41, %v1924_v1 }
0x136b   : > { %v2600_v55 = vpop.eup %2599  ;;  %v1938_v3 = vmul.f32 1.442695, %v1934_v2  ;;  %v2417_v2 = vld [vmem:[%s3398_s11 + $0x18] sm:$0x1f] }
0x136c   : > { %v1949_v56 = vsel %vm552_vm1, %v2600_v55, 0.0 }
0x136d   : > { %1950 = vadd.xlane.f32.xlu2 %v1949_v56  ;;  %v2477_v56 = vld [vmem:[%s3397_s10 + $0x68] sm:$0xff] }
0x1371   : > { %v1933_v57 = vpop.xlane.xlu1 %1932 }
0x1372   : > { %v1937_v58 = vsub.f32 %v1921_v46, %v1933_v57 }
0x1374   : > { %v1944_v5 = vmul.f32 1.442695, %v1937_v58 }
0x1376   : > { %2601 = vpow2.f32 %v1944_v5  ;;  %v2476_v5 = vld [vmem:[%s3397_s10 + $0x60] sm:$0xff] }
0x1377   : > { %v1930_v59 = vpop.xlane.xlu2 %1929 }
0x1378   : > { %v1936_v60 = vsub.f32 %v1891_v50, %v1930_v59 }
0x137a   : > { %v1942_v62 = vmul.f32 1.442695, %v1936_v60  ;;  %v2475_v60 = vld [vmem:[%s3397_s10 + $0x58] sm:$0xff] }
0x137c   : > { %v2602_v61 = vpop.eup %2601  ;;  %2603 = vpow2.f32 %v1942_v62 }
0x137d   : > { %v1955_v14 = vsel %vm552_vm1, %v2602_v61, 0.0  ;;  %2605 = vpow2.f32 %v1938_v3  ;;  %v2137_v3 = vperm.slane %v3113_v34, 7  ;;  %v2472_v34 = vld [vmem:[%s3397_s10 + $0x40] sm:$0xff] }
0x137e   : > { %1956 = vadd.xlane.f32.xlu0 %v1955_v14 }
0x1382   : > { %v2604_v63 = vpop.eup %2603 }
0x1383   : > { %v1952_v0 = vsel %vm552_vm1, %v2604_v63, 0.0  ;;  %v2606_v6 = vpop.eup %2605 }
0x1384   : > { %1953 = vadd.xlane.f32.xlu1 %v1952_v0  ;;  %v1946_v42 = vsel %vm552_vm1, %v2606_v6, 0.0 }
0x1385   : > { %1992 = vrot.lane.b32.xlu2 %v3223_v24, %s3457_s25  ;;  %s2380_s25 = sshll.u32 %s495_s28, 3 }
0x1386   : > { %s497_s23 = scalar_lea.vmem [#allocation2], %s2380_s25 }
0x1387   : > { %s2278_s19 = sshll.u32 %s497_s23, 4  ;;  %s2279_s19 = int_to_ptr.vmem [resolvable:$true] %s2278_s19 }
0x1392   : > { %2044 = vrot.lane.b32.xlu0 %v3223_v24, %s3460_s27 }
0x139a   : > { %1966 = vrot.lane.b32.xlu0 %v3223_v24, %s3458_s21  ;;  %s2483_s21 = sshll.u32 %s2794_s17, 3 }
0x139d   : > { %2018 = vrot.lane.b32.xlu1 %v3223_v24, %s3459_s26 }
0x13ae   : > { %1947 = vadd.xlane.f32.xlu2 %v1946_v42 }
0x13e0   : > { %v1951_v7 = vpop.xlane.xlu2 %1950 }
0x13e1   : > { %2607 = vrcp.f32 %v1951_v7  ;;  %v2139_v7 = vperm.slane %v2417_v2, 0 }
0x13e7   : > { %v2608_v8 = vpop.eup %2607 }
0x13e8   : > { %v1963_v9 = vmul.f32 %v2608_v8, %v2600_v55  ;;  %v1993_v19 = vpop.permute.xlu2 %1992  ;;  %v2478_v55 = vld [vmem:[%s3397_s10 + $0x70] sm:$0xff] }
0x13e9   : > { %2013 = vmatpush.msra.mxu2 %v1993_v19  ;;  %v2474_v19 = vld [vmem:[%s3397_s10 + $0x50] sm:$0xff] }
0x13ea   : > { %2459 = vmatmul.msk.f32.vlgmr.msra.gmra.mxu2 %vm552_vm1, %v1963_v9 }
0x13eb   : > { %2162 = vmatpush.msrb.mxu2 %v2470_v51 }
0x13f1   : > { %v1957_v10 = vpop.xlane.xlu0 %1956 }
0x13f2   : > { %2609 = vrcp.f32 %v1957_v10  ;;  %v2473_v10 = vld [vmem:[%s3397_s10 + $0x48] sm:$0xff] }
0x13f7   : > { %v1954_v12 = vpop.xlane.xlu1 %1953 }
0x13f8   : > { %v2610_v11 = vpop.eup %2609  ;;  %2611 = vrcp.f32 %v1954_v12 }
0x13f9   : > { %v1965_v13 = vmul.f32 %v2610_v11, %v2602_v61  ;;  %v2146_v11 = vperm.slane %v2417_v2, 1 }
0x13fe   : > { %v2612_v16 = vpop.eup %2611 }
0x13ff   : > { %v1964_v18 = vmul.f32 %v2612_v16, %v2604_v63 }
0x1404   : > { %v2045_v15 = vpop.permute.xlu0 %2044 }
0x1405   : > { %2065 = vmatpush.msra.mxu0 %v2045_v15 }
0x1406   : > { %2461 = vmatmul.msk.f32.vlgmr.msra.gmra.mxu0 %vm552_vm1, %v1965_v13 }
0x140c   : > { %v1967_v17 = vpop.permute.xlu0 %1966 }
0x140d   : > { %1987 = vmatpush.msra.mxu1 %v1967_v17  ;;  %v2182_v17 = vperm.slane %v2417_v2, 2 }
0x140f   : > { %v2019_v20 = vpop.permute.xlu1 %2018  ;;  %2106 = vmatpush.msrb.mxu1 %v2465_v28 }
0x1410   : > { %2039 = vmatpush.msrb.mxu3 %v2019_v20 }
0x1411   : > { %2460 = vmatmul.msk.f32.vlgmr.msrb.gmra.mxu3 %vm552_vm1, %v1964_v18  ;;  %2107 = vmatpush.msrb.mxu1 %v2464_v29  ;;  %v2236_v29 = vld [vmem:[%s3399_s12 + $0x18] sm:$0xff] }
0x1412   : > { %2194 = vmatpush.msra.mxu3 %v2479_v54  ;;  %2256 = vmatpush.msrb.mxu0 %v2236_v29 }
0x1413   : > { %2108 = vmatpush.msrb.mxu1 %v2463_v30  ;;  %v2235_v30 = vld [vmem:[%s3399_s12 + $0x10] sm:$0xff] }
0x1414   : > { %2195 = vmatpush.msra.mxu3 %v2478_v55  ;;  %2257 = vmatpush.msrb.mxu0 %v2235_v30 }
0x1415   : > { %2109 = vmatpush.msrb.mxu1 %v2462_v31  ;;  %v2234_v31 = vld [vmem:[%s3399_s12 + $0x8] sm:$0xff] }
0x1416   : > { %2196 = vmatpush.msra.mxu3 %v2477_v56  ;;  %2258 = vmatpush.msrb.mxu0 %v2234_v31 }
0x1418   : > { %2197 = vmatpush.msra.mxu3 %v2476_v5 }
0x141a   : > { %2198 = vmatpush.msra.mxu3 %v2475_v60 }
0x141c   : > { %2199 = vmatpush.msra.mxu3 %v2474_v19 }
0x141e   : > { %2200 = vmatpush.msra.mxu3 %v2473_v10 }
0x1420   : > { %2201 = vmatpush.msra.mxu3 %v2472_v34 }
0x1421   : > { %v1948_v22 = vpop.xlane.xlu2 %1947 }
0x1422   : > { %2613 = vrcp.f32 %v1948_v22 }
0x1428   : > { %v2614_v23 = vpop.eup %2613 }
0x1429   : > { %v1962_v24 = vmul.f32 %v2614_v23, %v2606_v6 }
0x142b   : > { %2458 = vmatmul.msk.f32.vlgmr.msra.gmra.mxu1 %vm552_vm1, %v1962_v24 }
0x146d   : > { %v2015_v25 = vpop.f32.mrf.mxu2 }
0x146e   : > { %2071 = vrot.lane.b32.xlu1 %v2015_v25, %s3461_s0  ;;  %s3468_s0 = sld [smem:[#allocation17_spill]] }
0x1474   : > { %s2639_s18 = scalar_lea.hbm %s3468_s0, 16 }
0x1483   : > { %v2067_v26 = vpop.f32.mrf.mxu0 }
0x1484   : > { %2079 = vrot.lane.b32.xlu1 %v2067_v26, %s3463_s15  ;;  %s2276_s15 = scalar_lea.hbm %s3468_s0, %s2483_s21 }
0x1485   : > { %s2280_s22 = sshll.u32 %s2276_s15, 4  ;;  %s2281_s22 = int_to_ptr.hbm [resolvable:$true] %s2280_s22 }
0x1486   : > { %s2633_s3 = sshra.s32 %s2281_s22, 4  ;;  %s2634_s3 = int_to_ptr.hbm [resolvable:$true] %s2633_s3 }
0x1487   : > { %s2635_s17 = scalar_lea.hbm %s2634_s3, 8  ;;  %p2640_p0 = scmp.lt.s32.totalorder %s2634_s3, %s3468_s0 }
0x1488   : > { %p2636_p11 = scmp.ne.s32.totalorder %s2634_s3, %s2635_s17  ;;  %p2641_p1 = scmp.lt.s32.totalorder %s2639_s18, %s2635_s17 }
0x148a   : > { %p2637_p12 = pnand %p2636_p11, %p2811_p5  ;;  %p2642_p2 = por %p2641_p1, %p2640_p0 }
0x148c   : > { %p2638_p13 = pneg %p2637_p12 }
0x148e   : > { %p2643_p3 = pnand %p2642_p2, %p2638_p13 }
0x1494   : > { %v2041_v27 = vpop.f32.mrf.mxu3 }
0x1495   : > { %2075 = vrot.lane.b32.xlu0 %v2041_v27, %s3462_s2 }
0x14a8   : > { %v1989_v35 = vpop.f32.mrf.mxu1 }
0x14e0   : > { %v2072_v32 = vpop.permute.xlu1 %2071 }
0x14e1   : > { %v2082_v36 = vsel %vm552_vm1, %v1989_v35, %v2072_v32  ;;  %v2233_v32 = vld [vmem:[%s3399_s12] sm:$0xff] }
0x14e2   : > { %2259 = vmatpush.msrb.mxu0 %v2233_v32 }
0x14f6   : > { %v2080_v4 = vpop.permute.xlu1 %2079 }
0x1507   : > { %v2076_v37 = vpop.permute.xlu0 %2075 }
0x1508   : > { %v2083_v38 = vsel %vm830_vm2, %v2082_v36, %v2076_v37 }
0x1509   : > { %v2084_v39 = vsel %vm832_vm3, %v2083_v38, %v2080_v4 }
0x150a   : > { %2466 = vmatmul.msk.f32.vlgmr.msrb.gmra.mxu1 %vm525_vm0, %v2084_v39 }
0x1587   : > { %v2111_v41 = vpop.f32.mrf.mxu1 }
0x1588   : > { %v2112_v43 = vadd.f32 %v2111_v41, %v2090_v40 }
0x158a   : > { %v2114_v44 = vadd.f32 %v2112_v43, %v3218_v21  ;;  %v2469_v21 = vld [vmem:[%s3396_s9 + $0x30] sm:$0xff] }
0x158b   : > { %2163 = vmatpush.msrb.mxu2 %v2469_v21 }
0x158c   : > { %v2115_v45 = vsel %vm525_vm0, %v2114_v44, 0.0 }
0x158d   : > { %2116 = vadd.xlane.f32.xlu0 %v2115_v45  ;;  %2164 = vmatpush.msrb.mxu2 %v2468_v52 }
0x158f   : > { %2165 = vmatpush.msrb.mxu2 %v2467_v53 }
0x1600   : > { %v2117_v46 = vpop.xlane.xlu0 %2116 }
0x1601   : > { %v2118_v47 = vmul.f32 %v2117_v46, %v2928_v33 }
0x1603   : > { %v2119_v48 = vsub.f32 %v2114_v44, %v2118_v47  ;;  %v2229_v44 = vperm.slane %v2417_v2, 3  ;;  %v2231_v47 = vperm.slane %v2417_v2, 4 }
0x1605   : > { %v2120_v49 = vmul.f32 %v2119_v48, %v2119_v48 }
0x1607   : > { %v2121_v50 = vsel %vm525_vm0, %v2120_v49, 0.0 }
0x1608   : > { %2122 = vadd.xlane.f32.xlu1 %v2121_v50 }
0x167b   : > { %v2123_v57 = vpop.xlane.xlu1 %2122 }
0x167c   : > { %v2124_v58 = vmul.f32 %v2123_v57, %v2928_v33 }
0x167e   : > { %v2125_v59 = vadd.f32 1e-05, %v2124_v58 }
0x1680   : > { %2615 = vrsqrt.f32 %v2125_v59  ;;  %vm2132_vm2 = vweird.f32 %v2125_v59 }
0x1686   : > { %v2616_v62 = vpop.eup %2615 }
0x1687   : > { %v2127_v61 = vmul.f32 %v2616_v62, %v2125_v59  ;;  %vm2133_vm1 = vweird.f32 %v2616_v62 }
0x1688   : > { %vm2134_vm3 = vmor %vm2132_vm2, %vm2133_vm1 }
0x1689   : > { %v2128_v14 = vmul.f32 %v2616_v62, %v2127_v61 }
0x168b   : > { %v2129_v63 = vmul.f32 0.5, %v2128_v14 }
0x168d   : > { %v2130_v0 = vsub.f32 1.5, %v2129_v63 }
0x168f   : > { %v2131_v1 = vmul.f32 %v2616_v62, %v2130_v0 }
0x1691   : > { %v2135_v6 = vsel %vm2134_vm3, %v2616_v62, %v2131_v1 }
0x1692   : > { %v2136_v42 = vmul.f32 %v2135_v6, %v2119_v48 }
0x1694   : > { %v2138_v8 = vmul.f32 %v2137_v3, %v2136_v42 }
0x1696   : > { %v2140_v9 = vadd.f32 %v2139_v7, %v2138_v8 }
0x1698   : > { %2471 = vmatmul.msk.f32.vlgmr.msrb.gmra.mxu2 %vm525_vm0, %v2140_v9 }
0x171b   : > { %v2167_v12 = vpop.f32.mrf.mxu2 }
0x171c   : > { %v2168_v13 = vadd.f32 %v2167_v12, %v2146_v11 }
0x171e   : > { %vm2170_vm7 = vcmp.gt.f32.partialorder %v2168_v13, 0.0  ;;  %v2171_v15 = vmul.f32 0.01, %v2168_v13 }
0x1720   : > { %v2172_v16 = vsel %vm2170_vm7, %v2168_v13, %v2171_v15 }
0x1721   : > { %2480 = vmatmul.msk.f32.vlgmr.msra.gmra.mxu3 %vm1328_vm12, %v2172_v16 }
0x17a4   : > { %v2203_v18 = vpop.f32.mrf.mxu3 }
0x17a5   : > { %v2204_v20 = vadd.f32 %v2203_v18, %v2182_v17 }
0x17a7   : > { %v2206_v22 = vadd.f32 %v2204_v20, %v2140_v9 }
0x17a9   : > { %v2207_v23 = vsel %vm525_vm0, %v2206_v22, 0.0 }
0x17aa   : > { %2208 = vadd.xlane.f32.xlu2 %v2207_v23 }
0x181d   : > { %v2209_v24 = vpop.xlane.xlu2 %2208 }
0x181e   : > { %v2210_v25 = vmul.f32 %v2209_v24, %v2928_v33 }
0x1820   : > { %v2211_v26 = vsub.f32 %v2206_v22, %v2210_v25 }
0x1822   : > { %v2212_v27 = vmul.f32 %v2211_v26, %v2211_v26 }
0x1824   : > { %v2213_v28 = vsel %vm525_vm0, %v2212_v27, 0.0 }
0x1825   : > { %2214 = vadd.xlane.f32.xlu2 %v2213_v28 }
0x1898   : > { %v2215_v35 = vpop.xlane.xlu2 %2214 }
0x1899   : > { %v2216_v36 = vmul.f32 %v2215_v35, %v2928_v33  ;;  %v2540_v33 = vld [vmem:[%s3470_s14] ss:$0 sm:$0xff] }
0x189b   : > { %v2217_v37 = vadd.f32 1e-05, %v2216_v36 }
0x189d   : > { %2617 = vrsqrt.f32 %v2217_v37  ;;  %vm2224_vm9 = vweird.f32 %v2217_v37 }
0x18a3   : > { %v2618_v4 = vpop.eup %2617 }
0x18a4   : > { %v2219_v38 = vmul.f32 %v2618_v4, %v2217_v37  ;;  %vm2225_vm8 = vweird.f32 %v2618_v4 }
0x18a5   : > { %vm2226_vm10 = vmor %vm2224_vm9, %vm2225_vm8 }
0x18a6   : > { %v2220_v39 = vmul.f32 %v2618_v4, %v2219_v38 }
0x18a8   : > { %v2221_v40 = vmul.f32 0.5, %v2220_v39 }
0x18aa   : > { %v2222_v41 = vsub.f32 1.5, %v2221_v40 }
0x18ac   : > { %v2223_v43 = vmul.f32 %v2618_v4, %v2222_v41 }
0x18ae   : > { %v2227_v45 = vsel %vm2226_vm10, %v2618_v4, %v2223_v43 }
0x18af   : > { %v2228_v46 = vmul.f32 %v2227_v45, %v2211_v26 }
0x18b1   : > { %v2230_v48 = vmul.f32 %v2229_v44, %v2228_v46 }
0x18b3   : > { %v2232_v49 = vadd.f32 %v2231_v47, %v2230_v48 }
0x18b5   : > { %2481 = vmatmul.msk.f32.vlgmr.msrb.gmra.mxu0 %vm525_vm0, %v2232_v49 }
0x1932   : > { %v2261_v50 = vpop.f32.mrf.mxu0 }
0x1933   : > { %v2262_v51 = vadd.f32 %v2540_v33, %v2261_v50 }
0x1935   : > { %2264 = vst [vmem:[%s497_s23] sm:$0xff] %v2262_v51 }
0x1936   : > { %2646 = shalt.err (!%p2643_p3)
}
0x1937   : > { %2486 = dma.vmem_to_hbm [thread:$0]  (%p2811_p5), %s2279_s19, 128, %s2281_s22, %s2266_s1  }
0x1938 PF: > { %s3471_s28 = sld [smem:[#allocation7_spill]] }
0x1939   : > { %s3472_s21 = sld [smem:[#allocation5_spill]] }
0x193e   : > { %p2492_p4 = scmp.ge.s32.totalorder %s3471_s28, 2 }
0x193f   : > { %s2292_s27 = sand.u32 1, %s3472_s21  }
0x1940   : > { %p2489_p7 = pnand %p2492_p4, %p2815_p6  ;;  %s2293_s15 = scalar_lea.sflag [#allocation3], %s2292_s27 }
0x1942   : > { %p2490_p8 = pneg %p2489_p7 }
0x1944   : > { %2664 = dma.done.wait (%p2490_p8), %s2293_s15, 128  }
0x1945   : > { %2666 = vsyncadd (%p2490_p8), %s2293_s15, 4294967168  ;;  %s3474_s16 = sld [smem:[#allocation8_spill]]  ;;  %s3477_s29 = smov %s2673_s30 }
0x1946   : > { %s3475_s24 = sld [smem:[#allocation6_spill]] }
0x1947   : > { %s3476_s15 = sld [smem:[#allocation9_spill]] }
0x194b   : > { %p24_p9 = scmp.ge.s32.totalorder %s3474_s16, 4  }
0x194c   : > { %s3478_s30 = smov %s3475_s24 }
0x194d   :  { %26 = sbr.rel (!%p24_p9) target bundleno = 10 (0xa), region = 128 }
0x1952   :  { %2299 = vsyncpa [#allocation3], 1 }
0x1953   :  { %2301 = vsyncpa [#allocation3 + $0x1], 1 }

</bundles_post_ra>
